<compile_context>
chip_gen: v7x
topology: tpu7x:2x2x1
jax: 0.10.0
libtpu: 0.0.40
codegen_flags: <defaults>
</compile_context>

<pallas_src>
import functools
import math

import jax
import jax.numpy as jnp
from jax import lax
from jax.experimental import pallas as pl
from jax.experimental.pallas import tpu as pltpu


def _layer_norm(x, gamma, beta, eps):
    mean = jnp.mean(x, axis=-1, keepdims=True)
    xc = x - mean
    var = jnp.mean(xc * xc, axis=-1, keepdims=True)
    return xc * lax.rsqrt(var + eps) * gamma + beta


def _decoder_layer_kernel(
    dec_ref, enc_ref,
    wq_ref, bq_ref, wk_ref, bk_ref, wv_ref, bv_ref,
    wo_ref, bo_ref, g1_ref, beta1_ref,
    w1_ref, b1_ref, w2_ref, b2_ref, g2_ref, beta2_ref,
    out_ref,
    *, n_heads, d_k, scale, eps):
    f32 = jnp.float32
    x = dec_ref[...]            # (S_q, d_model) -- current batch element
    enc = enc_ref[...]          # (S_k, d_model)
    in_dtype = x.dtype

    # --- Q/K/V projections: one fat matmul each (all heads at once) ---
    q = jnp.dot(x, wq_ref[...], preferred_element_type=f32) + bq_ref[...]
    k = jnp.dot(enc, wk_ref[...], preferred_element_type=f32) + bk_ref[...]
    v = jnp.dot(enc, wv_ref[...], preferred_element_type=f32) + bv_ref[...]

    # Fold 1/sqrt(d_k) into Q (S*D elems) instead of scaling scores (S*S elems).
    q = (q * scale).astype(in_dtype)
    k = k.astype(in_dtype)
    v = v.astype(in_dtype)

    # --- per-head scaled dot-product attention (heads statically unrolled) ---
    # The head-concat is folded into the output projection:
    #   concat_h(ctx_h) @ Wo == sum_h ctx_h @ Wo[h*d_k:(h+1)*d_k, :]
    wo = wo_ref[...]
    attn_out = jnp.zeros((q.shape[0], wo.shape[1]), f32)
    for h in range(n_heads):
        sl = slice(h * d_k, (h + 1) * d_k)
        qh, kh, vh = q[:, sl], k[:, sl], v[:, sl]
        # Q @ K^T without materializing a transpose: contract d_k of both operands.
        s = lax.dot_general(qh, kh,
                            dimension_numbers=(((1,), (1,)), ((), ())),
                            preferred_element_type=f32)
        m = jnp.max(s, axis=-1, keepdims=True)
        e = jnp.exp(s - m)
        denom = jnp.sum(e, axis=-1, keepdims=True)
        p = e * pl.reciprocal(denom, approx=True)        # EUP slot, frees VALU
        ctx_h = jnp.dot(p.astype(vh.dtype), vh, preferred_element_type=f32)
        attn_out = attn_out + jnp.dot(ctx_h.astype(in_dtype), wo[sl, :],
                                      preferred_element_type=f32)
    attn_out = attn_out + bo_ref[...]

    # --- residual + LayerNorm 1 ---
    h1 = _layer_norm(attn_out + x.astype(f32), g1_ref[...], beta1_ref[...], eps)

    # --- position-wise FFN (1x1 convs == matmuls) + residual + LayerNorm 2 ---
    ff = jnp.dot(h1.astype(in_dtype), w1_ref[...], preferred_element_type=f32) + b1_ref[...]
    ff = jnp.maximum(ff, 0.0)
    ff = jnp.dot(ff.astype(in_dtype), w2_ref[...], preferred_element_type=f32) + b2_ref[...]
    out_ref[...] = _layer_norm(ff + h1, g2_ref[...], beta2_ref[...], eps).astype(out_ref.dtype)


def decoder_layer(dec_inputs, enc_outputs, params, *, n_heads, eps=1e-5):
    """dec_inputs: [B, S_q, d_model], enc_outputs: [B, S_k, d_model] -> [B, S_q, d_model]."""
    B, S_q, D = dec_inputs.shape
    _, S_k, _ = enc_outputs.shape
    assert D % n_heads == 0
    d_k = D // n_heads
    scale = 1.0 / math.sqrt(d_k)

    def batch_spec(s, d):
        # one (s, d) tile per batch element; last two dims = full trailing extents
        return pl.BlockSpec((pl.Squeezed(), s, d), lambda b: (b, 0, 0))

    def full_spec(shape):
        # weights: single full-array block, re-used by every grid step
        return pl.BlockSpec(shape, lambda b, _n=len(shape): (0,) * _n)

    weights = [
        params["wq"], params["bq"], params["wk"], params["bk"],
        params["wv"], params["bv"], params["wo"], params["bo"],
        params["g1"], params["beta1"],
        params["w1"], params["b1"], params["w2"], params["b2"],
        params["g2"], params["beta2"],
    ]
    in_specs = [batch_spec(S_q, D), batch_spec(S_k, D)] + [full_spec(w.shape) for w in weights]

    kernel = functools.partial(
        _decoder_layer_kernel, n_heads=n_heads, d_k=d_k, scale=scale, eps=eps)

    return pl.pallas_call(
        kernel,
        out_shape=jax.ShapeDtypeStruct((B, S_q, D), dec_inputs.dtype),
        grid_spec=pltpu.PrefetchScalarGridSpec(
            num_scalar_prefetch=0,
            grid=(B,),                      # one fat step per batch element
            in_specs=in_specs,
            out_specs=batch_spec(S_q, D),
        ),
        compiler_params=pltpu.CompilerParams(
            dimension_semantics=("parallel",)),   # B>=2 -> both v7x TCs get work
    )(dec_inputs, enc_outputs, *weights)


def _reference(dec, enc, params, *, n_heads, eps=1e-5):
    B, S_q, D = dec.shape
    d_k = D // n_heads
    q = dec @ params["wq"] + params["bq"]
    k = enc @ params["wk"] + params["bk"]
    v = enc @ params["wv"] + params["bv"]

    def split(t):
        b, s, _ = t.shape
        return t.reshape(b, s, n_heads, d_k).transpose(0, 2, 1, 3)

    qh, kh, vh = split(q), split(k), split(v)
    scores = jnp.einsum("bhqd,bhkd->bhqk", qh, kh) / math.sqrt(d_k)
    attn = jax.nn.softmax(scores, axis=-1)
    ctx = jnp.einsum("bhqk,bhkd->bhqd", attn, vh)
    ctx = ctx.transpose(0, 2, 1, 3).reshape(B, S_q, D)
    out = ctx @ params["wo"] + params["bo"]

    def ln(x, g, b):
        mu = x.mean(-1, keepdims=True)
        var = ((x - mu) ** 2).mean(-1, keepdims=True)
        return (x - mu) / jnp.sqrt(var + eps) * g + b

    h1 = ln(out + dec, params["g1"], params["beta1"])
    ff = jnp.maximum(h1 @ params["w1"] + params["b1"], 0.0)
    ff = ff @ params["w2"] + params["b2"]
    return ln(ff + h1, params["g2"], params["beta2"])


if __name__ == "__main__":
    # args.d_model = 64, args.n_heads = 4 -> d_k = 16 ; d_ff = 2048 (module global)
    B, S_dec, S_enc = 2, 8, 8
    d_model, n_heads, d_ff = 64, 4, 2048
    f32 = jnp.float32

    key = jax.random.PRNGKey(0)
    keys = jax.random.split(key, 20)

    def w(k, shape, s):
        return jax.random.normal(k, shape, f32) * s

    dec = jax.random.normal(keys[0], (B, S_dec, d_model), f32)
    enc = jax.random.normal(keys[1], (B, S_enc, d_model), f32)

    params = {
        "wq": w(keys[2], (d_model, d_model), d_model ** -0.5),
        "bq": w(keys[3], (1, d_model), 0.02),
        "wk": w(keys[4], (d_model, d_model), d_model ** -0.5),
        "bk": w(keys[5], (1, d_model), 0.02),
        "wv": w(keys[6], (d_model, d_model), d_model ** -0.5),
        "bv": w(keys[7], (1, d_model), 0.02),
        "wo": w(keys[8], (d_model, d_model), d_model ** -0.5),
        "bo": w(keys[9], (1, d_model), 0.02),
        "g1": 1.0 + w(keys[10], (1, d_model), 0.02),
        "beta1": w(keys[11], (1, d_model), 0.02),
        "w1": w(keys[12], (d_model, d_ff), d_model ** -0.5),   # conv1 (kernel_size=1) as matmul
        "b1": w(keys[13], (1, d_ff), 0.02),
        "w2": w(keys[14], (d_ff, d_model), d_ff ** -0.5),      # conv2 (kernel_size=1) as matmul
        "b2": w(keys[15], (1, d_model), 0.02),
        "g2": 1.0 + w(keys[16], (1, d_model), 0.02),
        "beta2": w(keys[17], (1, d_model), 0.02),
    }

    out = decoder_layer(dec, enc, params, n_heads=n_heads)
    jax.block_until_ready(out)

    ref = _reference(dec, enc, params, n_heads=n_heads)
    assert out.shape == (B, S_dec, d_model)
    assert bool(jnp.all(jnp.isfinite(out)))
    # tolerance covers the EUP approx-reciprocal in the softmax denominator
    assert jnp.allclose(out, ref, atol=2e-2, rtol=2e-2), float(jnp.max(jnp.abs(out - ref)))

    print("KERNEL_OK")
</pallas_src>

<mosaic_0001>
module attributes {stable_mosaic.version = 11 : i64} {
  func.func @_decoder_layer_kernel(%arg0: i32, %arg1: memref<1x8x64xf32, #tpu.memory_space<vmem>>, %arg2: memref<1x8x64xf32, #tpu.memory_space<vmem>>, %arg3: memref<64x64xf32, #tpu.memory_space<vmem>>, %arg4: memref<1x64xf32, #tpu.memory_space<vmem>>, %arg5: memref<64x64xf32, #tpu.memory_space<vmem>>, %arg6: memref<1x64xf32, #tpu.memory_space<vmem>>, %arg7: memref<64x64xf32, #tpu.memory_space<vmem>>, %arg8: memref<1x64xf32, #tpu.memory_space<vmem>>, %arg9: memref<64x64xf32, #tpu.memory_space<vmem>>, %arg10: memref<1x64xf32, #tpu.memory_space<vmem>>, %arg11: memref<1x64xf32, #tpu.memory_space<vmem>>, %arg12: memref<1x64xf32, #tpu.memory_space<vmem>>, %arg13: memref<64x2048xf32, #tpu.memory_space<vmem>>, %arg14: memref<1x2048xf32, #tpu.memory_space<vmem>>, %arg15: memref<2048x64xf32, #tpu.memory_space<vmem>>, %arg16: memref<1x64xf32, #tpu.memory_space<vmem>>, %arg17: memref<1x64xf32, #tpu.memory_space<vmem>>, %arg18: memref<1x64xf32, #tpu.memory_space<vmem>>, %arg19: memref<1x8x64xf32, #tpu.memory_space<vmem>>) attributes {dimension_semantics = [#tpu.dimension_semantics<parallel>], iteration_bounds = array<i64: 2>, scalar_prefetch = 0 : i64, scratch_operands = 0 : i64, tpu.core_type = #tpu.core_type<tc>, window_params = [{transform_indices = @transform_0, window_bounds = array<i64: 1, 8, 64>}, {transform_indices = @transform_1, window_bounds = array<i64: 1, 8, 64>}, {pipeline_mode = #tpu.pipeline_mode<synchronous>, transform_indices = @transform_2, window_bounds = array<i64: 64, 64>}, {pipeline_mode = #tpu.pipeline_mode<synchronous>, transform_indices = @transform_3, window_bounds = array<i64: 1, 64>}, {pipeline_mode = #tpu.pipeline_mode<synchronous>, transform_indices = @transform_4, window_bounds = array<i64: 64, 64>}, {pipeline_mode = #tpu.pipeline_mode<synchronous>, transform_indices = @transform_5, window_bounds = array<i64: 1, 64>}, {pipeline_mode = #tpu.pipeline_mode<synchronous>, transform_indices = @transform_6, window_bounds = array<i64: 64, 64>}, {pipeline_mode = #tpu.pipeline_mode<synchronous>, transform_indices = @transform_7, window_bounds = array<i64: 1, 64>}, {pipeline_mode = #tpu.pipeline_mode<synchronous>, transform_indices = @transform_8, window_bounds = array<i64: 64, 64>}, {pipeline_mode = #tpu.pipeline_mode<synchronous>, transform_indices = @transform_9, window_bounds = array<i64: 1, 64>}, {pipeline_mode = #tpu.pipeline_mode<synchronous>, transform_indices = @transform_10, window_bounds = array<i64: 1, 64>}, {pipeline_mode = #tpu.pipeline_mode<synchronous>, transform_indices = @transform_11, window_bounds = array<i64: 1, 64>}, {pipeline_mode = #tpu.pipeline_mode<synchronous>, transform_indices = @transform_12, window_bounds = array<i64: 64, 2048>}, {pipeline_mode = #tpu.pipeline_mode<synchronous>, transform_indices = @transform_13, window_bounds = array<i64: 1, 2048>}, {pipeline_mode = #tpu.pipeline_mode<synchronous>, transform_indices = @transform_14, window_bounds = array<i64: 2048, 64>}, {pipeline_mode = #tpu.pipeline_mode<synchronous>, transform_indices = @transform_15, window_bounds = array<i64: 1, 64>}, {pipeline_mode = #tpu.pipeline_mode<synchronous>, transform_indices = @transform_16, window_bounds = array<i64: 1, 64>}, {pipeline_mode = #tpu.pipeline_mode<synchronous>, transform_indices = @transform_17, window_bounds = array<i64: 1, 64>}, {transform_indices = @transform_18, window_bounds = array<i64: 1, 8, 64>}]} {
    %c0 = arith.constant 0 : index
    %c0_0 = arith.constant 0 : index
    %c0_1 = arith.constant 0 : index
    %0 = vector.load %arg1[%c0, %c0_0, %c0_1] : memref<1x8x64xf32, #tpu.memory_space<vmem>>, vector<1x8x64xf32>
    %1 = vector.shape_cast %0 : vector<1x8x64xf32> to vector<8x64xf32>
    %c0_2 = arith.constant 0 : index
    %c0_3 = arith.constant 0 : index
    %c0_4 = arith.constant 0 : index
    %2 = vector.load %arg2[%c0_2, %c0_3, %c0_4] : memref<1x8x64xf32, #tpu.memory_space<vmem>>, vector<1x8x64xf32>
    %3 = vector.shape_cast %2 : vector<1x8x64xf32> to vector<8x64xf32>
    %c0_5 = arith.constant 0 : index
    %c0_6 = arith.constant 0 : index
    %4 = vector.load %arg3[%c0_5, %c0_6] : memref<64x64xf32, #tpu.memory_space<vmem>>, vector<64x64xf32>
    %cst = arith.constant dense<0.000000e+00> : vector<8x64xf32>
    %5 = tpu.matmul %1, %4, %cst {dimension_numbers = #tpu.dot_dimension_numbers<[1], [0], [0], [1], [0, 0, 1, 1], [], []>} : vector<8x64xf32>, vector<64x64xf32>, vector<8x64xf32> -> vector<8x64xf32>
    %c0_7 = arith.constant 0 : index
    %c0_8 = arith.constant 0 : index
    %6 = vector.load %arg4[%c0_7, %c0_8] : memref<1x64xf32, #tpu.memory_space<vmem>>, vector<1x64xf32>
    %7 = vector.broadcast %6 : vector<1x64xf32> to vector<8x64xf32>
    %8 = arith.addf %5, %7 : vector<8x64xf32>
    %c0_9 = arith.constant 0 : index
    %c0_10 = arith.constant 0 : index
    %9 = vector.load %arg5[%c0_9, %c0_10] : memref<64x64xf32, #tpu.memory_space<vmem>>, vector<64x64xf32>
    %cst_11 = arith.constant dense<0.000000e+00> : vector<8x64xf32>
    %10 = tpu.matmul %3, %9, %cst_11 {dimension_numbers = #tpu.dot_dimension_numbers<[1], [0], [0], [1], [0, 0, 1, 1], [], []>} : vector<8x64xf32>, vector<64x64xf32>, vector<8x64xf32> -> vector<8x64xf32>
    %c0_12 = arith.constant 0 : index
    %c0_13 = arith.constant 0 : index
    %11 = vector.load %arg6[%c0_12, %c0_13] : memref<1x64xf32, #tpu.memory_space<vmem>>, vector<1x64xf32>
    %12 = vector.broadcast %11 : vector<1x64xf32> to vector<8x64xf32>
    %13 = arith.addf %10, %12 : vector<8x64xf32>
    %c0_14 = arith.constant 0 : index
    %c0_15 = arith.constant 0 : index
    %14 = vector.load %arg7[%c0_14, %c0_15] : memref<64x64xf32, #tpu.memory_space<vmem>>, vector<64x64xf32>
    %cst_16 = arith.constant dense<0.000000e+00> : vector<8x64xf32>
    %15 = tpu.matmul %3, %14, %cst_16 {dimension_numbers = #tpu.dot_dimension_numbers<[1], [0], [0], [1], [0, 0, 1, 1], [], []>} : vector<8x64xf32>, vector<64x64xf32>, vector<8x64xf32> -> vector<8x64xf32>
    %c0_17 = arith.constant 0 : index
    %c0_18 = arith.constant 0 : index
    %16 = vector.load %arg8[%c0_17, %c0_18] : memref<1x64xf32, #tpu.memory_space<vmem>>, vector<1x64xf32>
    %17 = vector.broadcast %16 : vector<1x64xf32> to vector<8x64xf32>
    %18 = arith.addf %15, %17 : vector<8x64xf32>
    %cst_19 = arith.constant 2.500000e-01 : f32
    %19 = vector.broadcast %cst_19 : f32 to vector<8x64xf32>
    %20 = arith.mulf %8, %19 : vector<8x64xf32>
    %c0_20 = arith.constant 0 : index
    %c0_21 = arith.constant 0 : index
    %21 = vector.load %arg9[%c0_20, %c0_21] : memref<64x64xf32, #tpu.memory_space<vmem>>, vector<64x64xf32>
    %cst_22 = arith.constant 0.000000e+00 : f32
    %22 = vector.broadcast %cst_22 : f32 to vector<8x64xf32>
    %23 = vector.extract_strided_slice %20 {offsets = [0, 0], sizes = [8, 16], strides = [1, 1]} : vector<8x64xf32> to vector<8x16xf32>
    %24 = vector.extract_strided_slice %13 {offsets = [0, 0], sizes = [8, 16], strides = [1, 1]} : vector<8x64xf32> to vector<8x16xf32>
    %25 = vector.extract_strided_slice %18 {offsets = [0, 0], sizes = [8, 16], strides = [1, 1]} : vector<8x64xf32> to vector<8x16xf32>
    %cst_23 = arith.constant dense<0.000000e+00> : vector<8x8xf32>
    %26 = tpu.matmul %23, %24, %cst_23 {dimension_numbers = #tpu.dot_dimension_numbers<[1], [1], [0], [0], [0, 0, 1, 0], [], []>} : vector<8x16xf32>, vector<8x16xf32>, vector<8x8xf32> -> vector<8x8xf32>
    %cst_24 = arith.constant dense<0xFF800000> : vector<8xf32>
    %27 = vector.multi_reduction <maximumf>, %26, %cst_24 [1] : vector<8x8xf32> to vector<8xf32>
    %28 = vector.shape_cast %27 : vector<8xf32> to vector<8x1xf32>
    %29 = vector.broadcast %28 : vector<8x1xf32> to vector<8x8xf32>
    %30 = arith.subf %26, %29 : vector<8x8xf32>
    %31 = math.exp %30 : vector<8x8xf32>
    %cst_25 = arith.constant dense<0.000000e+00> : vector<8xf32>
    %32 = vector.multi_reduction <add>, %31, %cst_25 [1] : vector<8x8xf32> to vector<8xf32>
    %33 = vector.shape_cast %32 : vector<8xf32> to vector<8x1xf32>
    %34 = tpu.reciprocal %33 {approx = true} : vector<8x1xf32> -> vector<8x1xf32>
    %35 = vector.broadcast %34 : vector<8x1xf32> to vector<8x8xf32>
    %36 = arith.mulf %31, %35 : vector<8x8xf32>
    %cst_26 = arith.constant dense<0.000000e+00> : vector<8x16xf32>
    %37 = tpu.matmul %36, %25, %cst_26 {dimension_numbers = #tpu.dot_dimension_numbers<[1], [0], [0], [1], [0, 0, 1, 1], [], []>} : vector<8x8xf32>, vector<8x16xf32>, vector<8x16xf32> -> vector<8x16xf32>
    %38 = vector.extract_strided_slice %21 {offsets = [0, 0], sizes = [16, 64], strides = [1, 1]} : vector<64x64xf32> to vector<16x64xf32>
    %cst_27 = arith.constant dense<0.000000e+00> : vector<8x64xf32>
    %39 = tpu.matmul %37, %38, %cst_27 {dimension_numbers = #tpu.dot_dimension_numbers<[1], [0], [0], [1], [0, 0, 1, 1], [], []>} : vector<8x16xf32>, vector<16x64xf32>, vector<8x64xf32> -> vector<8x64xf32>
    %40 = arith.addf %22, %39 : vector<8x64xf32>
    %41 = vector.extract_strided_slice %20 {offsets = [0, 16], sizes = [8, 16], strides = [1, 1]} : vector<8x64xf32> to vector<8x16xf32>
    %42 = vector.extract_strided_slice %13 {offsets = [0, 16], sizes = [8, 16], strides = [1, 1]} : vector<8x64xf32> to vector<8x16xf32>
    %43 = vector.extract_strided_slice %18 {offsets = [0, 16], sizes = [8, 16], strides = [1, 1]} : vector<8x64xf32> to vector<8x16xf32>
    %cst_28 = arith.constant dense<0.000000e+00> : vector<8x8xf32>
    %44 = tpu.matmul %41, %42, %cst_28 {dimension_numbers = #tpu.dot_dimension_numbers<[1], [1], [0], [0], [0, 0, 1, 0], [], []>} : vector<8x16xf32>, vector<8x16xf32>, vector<8x8xf32> -> vector<8x8xf32>
    %cst_29 = arith.constant dense<0xFF800000> : vector<8xf32>
    %45 = vector.multi_reduction <maximumf>, %44, %cst_29 [1] : vector<8x8xf32> to vector<8xf32>
    %46 = vector.shape_cast %45 : vector<8xf32> to vector<8x1xf32>
    %47 = vector.broadcast %46 : vector<8x1xf32> to vector<8x8xf32>
    %48 = arith.subf %44, %47 : vector<8x8xf32>
    %49 = math.exp %48 : vector<8x8xf32>
    %cst_30 = arith.constant dense<0.000000e+00> : vector<8xf32>
    %50 = vector.multi_reduction <add>, %49, %cst_30 [1] : vector<8x8xf32> to vector<8xf32>
    %51 = vector.shape_cast %50 : vector<8xf32> to vector<8x1xf32>
    %52 = tpu.reciprocal %51 {approx = true} : vector<8x1xf32> -> vector<8x1xf32>
    %53 = vector.broadcast %52 : vector<8x1xf32> to vector<8x8xf32>
    %54 = arith.mulf %49, %53 : vector<8x8xf32>
    %cst_31 = arith.constant dense<0.000000e+00> : vector<8x16xf32>
    %55 = tpu.matmul %54, %43, %cst_31 {dimension_numbers = #tpu.dot_dimension_numbers<[1], [0], [0], [1], [0, 0, 1, 1], [], []>} : vector<8x8xf32>, vector<8x16xf32>, vector<8x16xf32> -> vector<8x16xf32>
    %56 = vector.extract_strided_slice %21 {offsets = [16, 0], sizes = [16, 64], strides = [1, 1]} : vector<64x64xf32> to vector<16x64xf32>
    %cst_32 = arith.constant dense<0.000000e+00> : vector<8x64xf32>
    %57 = tpu.matmul %55, %56, %cst_32 {dimension_numbers = #tpu.dot_dimension_numbers<[1], [0], [0], [1], [0, 0, 1, 1], [], []>} : vector<8x16xf32>, vector<16x64xf32>, vector<8x64xf32> -> vector<8x64xf32>
    %58 = arith.addf %40, %57 : vector<8x64xf32>
    %59 = vector.extract_strided_slice %20 {offsets = [0, 32], sizes = [8, 16], strides = [1, 1]} : vector<8x64xf32> to vector<8x16xf32>
    %60 = vector.extract_strided_slice %13 {offsets = [0, 32], sizes = [8, 16], strides = [1, 1]} : vector<8x64xf32> to vector<8x16xf32>
    %61 = vector.extract_strided_slice %18 {offsets = [0, 32], sizes = [8, 16], strides = [1, 1]} : vector<8x64xf32> to vector<8x16xf32>
    %cst_33 = arith.constant dense<0.000000e+00> : vector<8x8xf32>
    %62 = tpu.matmul %59, %60, %cst_33 {dimension_numbers = #tpu.dot_dimension_numbers<[1], [1], [0], [0], [0, 0, 1, 0], [], []>} : vector<8x16xf32>, vector<8x16xf32>, vector<8x8xf32> -> vector<8x8xf32>
    %cst_34 = arith.constant dense<0xFF800000> : vector<8xf32>
    %63 = vector.multi_reduction <maximumf>, %62, %cst_34 [1] : vector<8x8xf32> to vector<8xf32>
    %64 = vector.shape_cast %63 : vector<8xf32> to vector<8x1xf32>
    %65 = vector.broadcast %64 : vector<8x1xf32> to vector<8x8xf32>
    %66 = arith.subf %62, %65 : vector<8x8xf32>
    %67 = math.exp %66 : vector<8x8xf32>
    %cst_35 = arith.constant dense<0.000000e+00> : vector<8xf32>
    %68 = vector.multi_reduction <add>, %67, %cst_35 [1] : vector<8x8xf32> to vector<8xf32>
    %69 = vector.shape_cast %68 : vector<8xf32> to vector<8x1xf32>
    %70 = tpu.reciprocal %69 {approx = true} : vector<8x1xf32> -> vector<8x1xf32>
    %71 = vector.broadcast %70 : vector<8x1xf32> to vector<8x8xf32>
    %72 = arith.mulf %67, %71 : vector<8x8xf32>
    %cst_36 = arith.constant dense<0.000000e+00> : vector<8x16xf32>
    %73 = tpu.matmul %72, %61, %cst_36 {dimension_numbers = #tpu.dot_dimension_numbers<[1], [0], [0], [1], [0, 0, 1, 1], [], []>} : vector<8x8xf32>, vector<8x16xf32>, vector<8x16xf32> -> vector<8x16xf32>
    %74 = vector.extract_strided_slice %21 {offsets = [32, 0], sizes = [16, 64], strides = [1, 1]} : vector<64x64xf32> to vector<16x64xf32>
    %cst_37 = arith.constant dense<0.000000e+00> : vector<8x64xf32>
    %75 = tpu.matmul %73, %74, %cst_37 {dimension_numbers = #tpu.dot_dimension_numbers<[1], [0], [0], [1], [0, 0, 1, 1], [], []>} : vector<8x16xf32>, vector<16x64xf32>, vector<8x64xf32> -> vector<8x64xf32>
    %76 = arith.addf %58, %75 : vector<8x64xf32>
    %77 = vector.extract_strided_slice %20 {offsets = [0, 48], sizes = [8, 16], strides = [1, 1]} : vector<8x64xf32> to vector<8x16xf32>
    %78 = vector.extract_strided_slice %13 {offsets = [0, 48], sizes = [8, 16], strides = [1, 1]} : vector<8x64xf32> to vector<8x16xf32>
    %79 = vector.extract_strided_slice %18 {offsets = [0, 48], sizes = [8, 16], strides = [1, 1]} : vector<8x64xf32> to vector<8x16xf32>
    %cst_38 = arith.constant dense<0.000000e+00> : vector<8x8xf32>
    %80 = tpu.matmul %77, %78, %cst_38 {dimension_numbers = #tpu.dot_dimension_numbers<[1], [1], [0], [0], [0, 0, 1, 0], [], []>} : vector<8x16xf32>, vector<8x16xf32>, vector<8x8xf32> -> vector<8x8xf32>
    %cst_39 = arith.constant dense<0xFF800000> : vector<8xf32>
    %81 = vector.multi_reduction <maximumf>, %80, %cst_39 [1] : vector<8x8xf32> to vector<8xf32>
    %82 = vector.shape_cast %81 : vector<8xf32> to vector<8x1xf32>
    %83 = vector.broadcast %82 : vector<8x1xf32> to vector<8x8xf32>
    %84 = arith.subf %80, %83 : vector<8x8xf32>
    %85 = math.exp %84 : vector<8x8xf32>
    %cst_40 = arith.constant dense<0.000000e+00> : vector<8xf32>
    %86 = vector.multi_reduction <add>, %85, %cst_40 [1] : vector<8x8xf32> to vector<8xf32>
    %87 = vector.shape_cast %86 : vector<8xf32> to vector<8x1xf32>
    %88 = tpu.reciprocal %87 {approx = true} : vector<8x1xf32> -> vector<8x1xf32>
    %89 = vector.broadcast %88 : vector<8x1xf32> to vector<8x8xf32>
    %90 = arith.mulf %85, %89 : vector<8x8xf32>
    %cst_41 = arith.constant dense<0.000000e+00> : vector<8x16xf32>
    %91 = tpu.matmul %90, %79, %cst_41 {dimension_numbers = #tpu.dot_dimension_numbers<[1], [0], [0], [1], [0, 0, 1, 1], [], []>} : vector<8x8xf32>, vector<8x16xf32>, vector<8x16xf32> -> vector<8x16xf32>
    %92 = vector.extract_strided_slice %21 {offsets = [48, 0], sizes = [16, 64], strides = [1, 1]} : vector<64x64xf32> to vector<16x64xf32>
    %cst_42 = arith.constant dense<0.000000e+00> : vector<8x64xf32>
    %93 = tpu.matmul %91, %92, %cst_42 {dimension_numbers = #tpu.dot_dimension_numbers<[1], [0], [0], [1], [0, 0, 1, 1], [], []>} : vector<8x16xf32>, vector<16x64xf32>, vector<8x64xf32> -> vector<8x64xf32>
    %94 = arith.addf %76, %93 : vector<8x64xf32>
    %c0_43 = arith.constant 0 : index
    %c0_44 = arith.constant 0 : index
    %95 = vector.load %arg10[%c0_43, %c0_44] : memref<1x64xf32, #tpu.memory_space<vmem>>, vector<1x64xf32>
    %96 = vector.broadcast %95 : vector<1x64xf32> to vector<8x64xf32>
    %97 = arith.addf %94, %96 : vector<8x64xf32>
    %98 = arith.addf %97, %1 : vector<8x64xf32>
    %c0_45 = arith.constant 0 : index
    %c0_46 = arith.constant 0 : index
    %99 = vector.load %arg11[%c0_45, %c0_46] : memref<1x64xf32, #tpu.memory_space<vmem>>, vector<1x64xf32>
    %c0_47 = arith.constant 0 : index
    %c0_48 = arith.constant 0 : index
    %100 = vector.load %arg12[%c0_47, %c0_48] : memref<1x64xf32, #tpu.memory_space<vmem>>, vector<1x64xf32>
    %cst_49 = arith.constant dense<0.000000e+00> : vector<8xf32>
    %101 = vector.multi_reduction <add>, %98, %cst_49 [1] : vector<8x64xf32> to vector<8xf32>
    %102 = vector.shape_cast %101 : vector<8xf32> to vector<8x1xf32>
    %cst_50 = arith.constant 6.400000e+01 : f32
    %103 = vector.broadcast %cst_50 : f32 to vector<8x1xf32>
    %104 = arith.divf %102, %103 : vector<8x1xf32>
    %105 = vector.broadcast %104 : vector<8x1xf32> to vector<8x64xf32>
    %106 = arith.subf %98, %105 : vector<8x64xf32>
    %107 = arith.mulf %106, %106 : vector<8x64xf32>
    %cst_51 = arith.constant dense<0.000000e+00> : vector<8xf32>
    %108 = vector.multi_reduction <add>, %107, %cst_51 [1] : vector<8x64xf32> to vector<8xf32>
    %109 = vector.shape_cast %108 : vector<8xf32> to vector<8x1xf32>
    %cst_52 = arith.constant 6.400000e+01 : f32
    %110 = vector.broadcast %cst_52 : f32 to vector<8x1xf32>
    %111 = arith.divf %109, %110 : vector<8x1xf32>
    %cst_53 = arith.constant 9.99999974E-6 : f32
    %112 = vector.broadcast %cst_53 : f32 to vector<8x1xf32>
    %113 = arith.addf %111, %112 : vector<8x1xf32>
    %114 = math.rsqrt %113 : vector<8x1xf32>
    %115 = vector.broadcast %114 : vector<8x1xf32> to vector<8x64xf32>
    %116 = arith.mulf %106, %115 : vector<8x64xf32>
    %117 = vector.broadcast %99 : vector<1x64xf32> to vector<8x64xf32>
    %118 = arith.mulf %116, %117 : vector<8x64xf32>
    %119 = vector.broadcast %100 : vector<1x64xf32> to vector<8x64xf32>
    %120 = arith.addf %118, %119 : vector<8x64xf32>
    %c0_54 = arith.constant 0 : index
    %c0_55 = arith.constant 0 : index
    %121 = vector.load %arg13[%c0_54, %c0_55] : memref<64x2048xf32, #tpu.memory_space<vmem>>, vector<64x2048xf32>
    %cst_56 = arith.constant dense<0.000000e+00> : vector<8x2048xf32>
    %122 = tpu.matmul %120, %121, %cst_56 {dimension_numbers = #tpu.dot_dimension_numbers<[1], [0], [0], [1], [0, 0, 1, 1], [], []>} : vector<8x64xf32>, vector<64x2048xf32>, vector<8x2048xf32> -> vector<8x2048xf32>
    %c0_57 = arith.constant 0 : index
    %c0_58 = arith.constant 0 : index
    %123 = vector.load %arg14[%c0_57, %c0_58] : memref<1x2048xf32, #tpu.memory_space<vmem>>, vector<1x2048xf32>
    %124 = vector.broadcast %123 : vector<1x2048xf32> to vector<8x2048xf32>
    %125 = arith.addf %122, %124 : vector<8x2048xf32>
    %cst_59 = arith.constant 0.000000e+00 : f32
    %126 = vector.broadcast %cst_59 : f32 to vector<8x2048xf32>
    %127 = arith.maximumf %125, %126 : vector<8x2048xf32>
    %c0_60 = arith.constant 0 : index
    %c0_61 = arith.constant 0 : index
    %128 = vector.load %arg15[%c0_60, %c0_61] : memref<2048x64xf32, #tpu.memory_space<vmem>>, vector<2048x64xf32>
    %cst_62 = arith.constant dense<0.000000e+00> : vector<8x64xf32>
    %129 = tpu.matmul %127, %128, %cst_62 {dimension_numbers = #tpu.dot_dimension_numbers<[1], [0], [0], [1], [0, 0, 1, 1], [], []>} : vector<8x2048xf32>, vector<2048x64xf32>, vector<8x64xf32> -> vector<8x64xf32>
    %c0_63 = arith.constant 0 : index
    %c0_64 = arith.constant 0 : index
    %130 = vector.load %arg16[%c0_63, %c0_64] : memref<1x64xf32, #tpu.memory_space<vmem>>, vector<1x64xf32>
    %131 = vector.broadcast %130 : vector<1x64xf32> to vector<8x64xf32>
    %132 = arith.addf %129, %131 : vector<8x64xf32>
    %133 = arith.addf %132, %120 : vector<8x64xf32>
    %c0_65 = arith.constant 0 : index
    %c0_66 = arith.constant 0 : index
    %134 = vector.load %arg17[%c0_65, %c0_66] : memref<1x64xf32, #tpu.memory_space<vmem>>, vector<1x64xf32>
    %c0_67 = arith.constant 0 : index
    %c0_68 = arith.constant 0 : index
    %135 = vector.load %arg18[%c0_67, %c0_68] : memref<1x64xf32, #tpu.memory_space<vmem>>, vector<1x64xf32>
    %cst_69 = arith.constant dense<0.000000e+00> : vector<8xf32>
    %136 = vector.multi_reduction <add>, %133, %cst_69 [1] : vector<8x64xf32> to vector<8xf32>
    %137 = vector.shape_cast %136 : vector<8xf32> to vector<8x1xf32>
    %cst_70 = arith.constant 6.400000e+01 : f32
    %138 = vector.broadcast %cst_70 : f32 to vector<8x1xf32>
    %139 = arith.divf %137, %138 : vector<8x1xf32>
    %140 = vector.broadcast %139 : vector<8x1xf32> to vector<8x64xf32>
    %141 = arith.subf %133, %140 : vector<8x64xf32>
    %142 = arith.mulf %141, %141 : vector<8x64xf32>
    %cst_71 = arith.constant dense<0.000000e+00> : vector<8xf32>
    %143 = vector.multi_reduction <add>, %142, %cst_71 [1] : vector<8x64xf32> to vector<8xf32>
    %144 = vector.shape_cast %143 : vector<8xf32> to vector<8x1xf32>
    %cst_72 = arith.constant 6.400000e+01 : f32
    %145 = vector.broadcast %cst_72 : f32 to vector<8x1xf32>
    %146 = arith.divf %144, %145 : vector<8x1xf32>
    %cst_73 = arith.constant 9.99999974E-6 : f32
    %147 = vector.broadcast %cst_73 : f32 to vector<8x1xf32>
    %148 = arith.addf %146, %147 : vector<8x1xf32>
    %149 = math.rsqrt %148 : vector<8x1xf32>
    %150 = vector.broadcast %149 : vector<8x1xf32> to vector<8x64xf32>
    %151 = arith.mulf %141, %150 : vector<8x64xf32>
    %152 = vector.broadcast %134 : vector<1x64xf32> to vector<8x64xf32>
    %153 = arith.mulf %151, %152 : vector<8x64xf32>
    %154 = vector.broadcast %135 : vector<1x64xf32> to vector<8x64xf32>
    %155 = arith.addf %153, %154 : vector<8x64xf32>
    %c0_74 = arith.constant 0 : index
    %c0_75 = arith.constant 0 : index
    %c0_76 = arith.constant 0 : index
    %156 = vector.load %arg19[%c0_74, %c0_75, %c0_76] : memref<1x8x64xf32, #tpu.memory_space<vmem>>, vector<1x8x64xf32>
    %157 = vector.shape_cast %156 : vector<1x8x64xf32> to vector<8x64xf32>
    %158 = vector.shape_cast %155 : vector<8x64xf32> to vector<1x8x64xf32>
    tpu.vector_store %arg19[%c0_74, %c0_75, %c0_76], %158 {strides = array<i32>} : memref<1x8x64xf32, #tpu.memory_space<vmem>>, vector<1x8x64xf32>,
    return
  }
  func.func @transform_0(%arg0: i32) -> (i32, i32, i32) {
    %c0_i32 = arith.constant 0 : i32
    %c0_i32_0 = arith.constant 0 : i32
    %c0_i32_1 = arith.constant 0 : i32
    return %arg0, %c0_i32, %c0_i32_0 : i32, i32, i32
  }
  func.func @transform_1(%arg0: i32) -> (i32, i32, i32) {
    %c0_i32 = arith.constant 0 : i32
    %c0_i32_0 = arith.constant 0 : i32
    %c0_i32_1 = arith.constant 0 : i32
    return %arg0, %c0_i32, %c0_i32_0 : i32, i32, i32
  }
  func.func @transform_2(%arg0: i32) -> (i32, i32) {
    %c0_i32 = arith.constant 0 : i32
    %c0_i32_0 = arith.constant 0 : i32
    %c0_i32_1 = arith.constant 0 : i32
    return %c0_i32, %c0_i32_0 : i32, i32
  }
  func.func @transform_3(%arg0: i32) -> (i32, i32) {
    %c0_i32 = arith.constant 0 : i32
    %c0_i32_0 = arith.constant 0 : i32
    %c0_i32_1 = arith.constant 0 : i32
    return %c0_i32, %c0_i32_0 : i32, i32
  }
  func.func @transform_4(%arg0: i32) -> (i32, i32) {
    %c0_i32 = arith.constant 0 : i32
    %c0_i32_0 = arith.constant 0 : i32
    %c0_i32_1 = arith.constant 0 : i32
    return %c0_i32, %c0_i32_0 : i32, i32
  }
  func.func @transform_5(%arg0: i32) -> (i32, i32) {
    %c0_i32 = arith.constant 0 : i32
    %c0_i32_0 = arith.constant 0 : i32
    %c0_i32_1 = arith.constant 0 : i32
    return %c0_i32, %c0_i32_0 : i32, i32
  }
  func.func @transform_6(%arg0: i32) -> (i32, i32) {
    %c0_i32 = arith.constant 0 : i32
    %c0_i32_0 = arith.constant 0 : i32
    %c0_i32_1 = arith.constant 0 : i32
    return %c0_i32, %c0_i32_0 : i32, i32
  }
  func.func @transform_7(%arg0: i32) -> (i32, i32) {
    %c0_i32 = arith.constant 0 : i32
    %c0_i32_0 = arith.constant 0 : i32
    %c0_i32_1 = arith.constant 0 : i32
    return %c0_i32, %c0_i32_0 : i32, i32
  }
  func.func @transform_8(%arg0: i32) -> (i32, i32) {
    %c0_i32 = arith.constant 0 : i32
    %c0_i32_0 = arith.constant 0 : i32
    %c0_i32_1 = arith.constant 0 : i32
    return %c0_i32, %c0_i32_0 : i32, i32
  }
  func.func @transform_9(%arg0: i32) -> (i32, i32) {
    %c0_i32 = arith.constant 0 : i32
    %c0_i32_0 = arith.constant 0 : i32
    %c0_i32_1 = arith.constant 0 : i32
    return %c0_i32, %c0_i32_0 : i32, i32
  }
  func.func @transform_10(%arg0: i32) -> (i32, i32) {
    %c0_i32 = arith.constant 0 : i32
    %c0_i32_0 = arith.constant 0 : i32
    %c0_i32_1 = arith.constant 0 : i32
    return %c0_i32, %c0_i32_0 : i32, i32
  }
  func.func @transform_11(%arg0: i32) -> (i32, i32) {
    %c0_i32 = arith.constant 0 : i32
    %c0_i32_0 = arith.constant 0 : i32
    %c0_i32_1 = arith.constant 0 : i32
    return %c0_i32, %c0_i32_0 : i32, i32
  }
  func.func @transform_12(%arg0: i32) -> (i32, i32) {
    %c0_i32 = arith.constant 0 : i32
    %c0_i32_0 = arith.constant 0 : i32
    %c0_i32_1 = arith.constant 0 : i32
    return %c0_i32, %c0_i32_0 : i32, i32
  }
  func.func @transform_13(%arg0: i32) -> (i32, i32) {
    %c0_i32 = arith.constant 0 : i32
    %c0_i32_0 = arith.constant 0 : i32
    %c0_i32_1 = arith.constant 0 : i32
    return %c0_i32, %c0_i32_0 : i32, i32
  }
  func.func @transform_14(%arg0: i32) -> (i32, i32) {
    %c0_i32 = arith.constant 0 : i32
    %c0_i32_0 = arith.constant 0 : i32
    %c0_i32_1 = arith.constant 0 : i32
    return %c0_i32, %c0_i32_0 : i32, i32
  }
  func.func @transform_15(%arg0: i32) -> (i32, i32) {
    %c0_i32 = arith.constant 0 : i32
    %c0_i32_0 = arith.constant 0 : i32
    %c0_i32_1 = arith.constant 0 : i32
    return %c0_i32, %c0_i32_0 : i32, i32
  }
  func.func @transform_16(%arg0: i32) -> (i32, i32) {
    %c0_i32 = arith.constant 0 : i32
    %c0_i32_0 = arith.constant 0 : i32
    %c0_i32_1 = arith.constant 0 : i32
    return %c0_i32, %c0_i32_0 : i32, i32
  }
  func.func @transform_17(%arg0: i32) -> (i32, i32) {
    %c0_i32 = arith.constant 0 : i32
    %c0_i32_0 = arith.constant 0 : i32
    %c0_i32_1 = arith.constant 0 : i32
    return %c0_i32, %c0_i32_0 : i32, i32
  }
  func.func @transform_18(%arg0: i32) -> (i32, i32, i32) {
    %c0_i32 = arith.constant 0 : i32
    %c0_i32_0 = arith.constant 0 : i32
    %c0_i32_1 = arith.constant 0 : i32
    return %arg0, %c0_i32, %c0_i32_0 : i32, i32, i32
  }
}

</mosaic_0001>

<bundles_post_ra>
// kernel: tpu_custom_call.1
= control target key start
LH: loop header
LB: loop body
LE: loop exit
PB: predicated region body
PF: predicated region fallthrough
CT: control target
= control target key end

     0   :  { %s6381_s0 = inlined_call_operand.vmem [shape: f32[2,8,64], index: 0, kind: input, shape index: {}]   ;;  %s6382_s1 = inlined_call_operand.vmem [shape: f32[2,8,64], index: 1, kind: input, shape index: {}]   ;;  %s6383_s2 = inlined_call_operand.vmem [shape: f32[64,64], index: 2, kind: input, shape index: {}]   ;;  %s6384_s3 = inlined_call_operand.vmem [shape: f32[1,64], index: 3, kind: input, shape index: {}]   ;;  %s6385_s4 = inlined_call_operand.vmem [shape: f32[64,64], index: 4, kind: input, shape index: {}]   ;;  %s6386_s5 = inlined_call_operand.vmem [shape: f32[1,64], index: 5, kind: input, shape index: {}]   ;;  %s6387_s6 = inlined_call_operand.vmem [shape: f32[64,64], index: 6, kind: input, shape index: {}]   ;;  %s6388_s7 = inlined_call_operand.vmem [shape: f32[1,64], index: 7, kind: input, shape index: {}]   ;;  %s6389_s8 = inlined_call_operand.vmem [shape: f32[64,64], index: 8, kind: input, shape index: {}]   ;;  %s6390_s9 = inlined_call_operand.vmem [shape: f32[1,64], index: 9, kind: input, shape index: {}]   ;;  %s6391_s10 = inlined_call_operand.vmem [shape: f32[1,64], index: 10, kind: input, shape index: {}]   ;;  %s6392_s11 = inlined_call_operand.vmem [shape: f32[1,64], index: 11, kind: input, shape index: {}]   ;;  %s6393_s12 = inlined_call_operand.vmem [shape: f32[64,2048], index: 12, kind: input, shape index: {}]   ;;  %s6394_s13 = inlined_call_operand.vmem [shape: f32[1,2048], index: 13, kind: input, shape index: {}]   ;;  %s6395_s14 = inlined_call_operand.vmem [shape: f32[2048,64], index: 14, kind: input, shape index: {}]   ;;  %s6396_s15 = inlined_call_operand.vmem [shape: f32[1,64], index: 15, kind: input, shape index: {}]   ;;  %s6397_s16 = inlined_call_operand.vmem [shape: f32[1,64], index: 16, kind: input, shape index: {}]   ;;  %s6398_s17 = inlined_call_operand.vmem [shape: f32[1,64], index: 17, kind: input, shape index: {}]   ;;  %s6399_s18 = inlined_call_operand.hbm [shape: f32[2,8,64], index: 18, kind: output, shape index: {}]  }
   0x1   :  { %6407 = sst [smem:[#allocation11_spill]] %s6381_s0 }
   0x2   :  { %6408 = sst [smem:[#allocation12_spill]] %s6382_s1 }
   0x3   :  { %6409 = sst [smem:[#allocation13_spill]] %s6383_s2 }
   0x4   :  { %6410 = sst [smem:[#allocation14_spill]] %s6385_s4 }
   0x5   :  { %23 = vsyncpa [#allocation3], 0 }
   0x6   :  { %25 = vsyncpa [#allocation3 + $0x1], 0  ;;  %s4760_s27 = smov 0   ;;  %s4762_s28 = smov 0  }
   0x7   :  { %s4764_s29 = smov 0   ;;  %s4766_s30 = smov 0  }
   0x8 LB: > { %6411 = sst [smem:[#allocation5_spill]] %s4644_s27  ;;  %s4781_s0 = sadd.s32 4294967295, %s4656_s30   ;;  %s4656_s30 = sphi %s4766_s30, %s6426_s30   ;;  %s4652_s29 = sphi %s4764_s29, %s6428_s29   ;;  %s4648_s28 = sphi %s4762_s28, %s6430_s28   ;;  %s4644_s27 = sphi %s4760_s27, %s6429_s27  }
   0x9   : > { %6412 = sst [smem:[#allocation6_spill]] %s4652_s29  ;;  %s3590_s19 = sadd.s32 4294967294, %s4656_s30  }
   0xa   : > { %6413 = sst [smem:[#allocation7_spill]] %s4656_s30  ;;  %s4785_s1 = sadd.s32 1, %s4656_s30  }
   0xb   : > { %6414 = sst [smem:[#allocation8_spill]] %s4785_s1  ;;  %s426_s20 = sadd.s32 1, %s4652_s29 }
   0xc   : > { %s423_s21 = ssub.s32 %s4656_s30, %s4785_s1  ;;  %p436_p0 = scmp.ne.s32.totalorder %s4652_s29, %s4648_s28 }
   0xd   : > { %p424_p1 = scmp.eq.s32.totalorder %s423_s21, 0  ;;  %p437_p2 = scmp.eq.s32.totalorder %s4781_s0, 1 }
   0xe   : > { %p442_p3 = scmp.ne.s32.totalorder %s4648_s28, %s4644_s27  ;;  %p443_p4 = scmp.eq.s32.totalorder %s3590_s19, 1 }
   0xf   : > { %s4796_s22 = scalar_select %p424_p1, %s4652_s29, %s426_s20  }
  0x10   : > { %p4798_p5 = por %p437_p2, %p436_p0  ;;  %p4802_p6 = por %p443_p4, %p442_p3 }
  0x11   : > { %6415 = sst [smem:[#allocation9_spill]] %s4796_s22  ;;  %p3593_p7 = scmp.ge.s32.totalorder %s4656_s30, 1 }
  0x12   : > { %s6417_s23 = scalar_select %p4802_p6, 1, 0 }
  0x13   : > { %p523_p8 = scmp.lt.s32.totalorder %s4656_s30, 3 }
  0x14   : > { %6418 = sst [smem:[#allocation10_spill]] %s6417_s23 }
  0x15   : > { %p524_p9 = pnand %p3593_p7, %p523_p8 }
  0x16   : > { %s6419_s4 = sld [smem:[#allocation14_spill]] (!%p524_p9)  ;;  %s6420_s22 = sld [smem:[#allocation13_spill]] (!%p524_p9)  ;;  %v4658_v3 = vmov (!%p524_p9), 0.0|0.0   ;;  %vm4659_vm0 = vmmov (!%p524_p9), 0   ;;  %v4660_v11 = vmov (!%p524_p9), 0.0   ;;  %vm605_vm1 = vcmask (!%p524_p9), 523264  }
  0x17   : > { %527 = sbr.rel (%p524_p9) target bundleno = 4196 (0x1064), region = 92  ;;  %4109 = vmatprep.subr.bf16.mxu1 (!%p524_p9), %v4658_v3  ;;  %4097 = vmatprep.subr.bf16.mxu0 (!%p524_p9), %v4658_v3  ;;  %p580_p10 = scmp.lt.s32.totalorder (!%p524_p9), %s4781_s0, 1  ;;  %v3599_v28 = vld [vmem:[%s6386_s5] ss:$0 sm:$0xff] (!%p524_p9)  ;;  %vm861_vm2 = vcmask (!%p524_p9), 130048   ;;  %v768_v38 = vld [vmem:[%s6387_s6 + $0x8] sm:$0xff] (!%p524_p9) }
  0x18   : > { %4007 = vmatprep.mubr.msk.f32.mxu1 (!%p524_p9), %vm4659_vm0, %v4660_v11  ;;  %3988 = vmatprep.mubr.msk.f32.mxu0 (!%p524_p9), %vm4659_vm0, %v4660_v11  ;;  %s6421_s1 = sld [smem:[#allocation12_spill]] (!%p524_p9)  ;;  %s6422_s24 = sld [smem:[#allocation11_spill]] (!%p524_p9)  ;;  %v3597_v29 = vld [vmem:[%s6384_s3] ss:$0 sm:$0xff] (!%p524_p9)  ;;  %v769_v39 = vld [vmem:[%s6387_s6 + $0x10] sm:$0xff] (!%p524_p9)  ;;  %v770_v41 = vld [vmem:[%s6387_s6 + $0x18] sm:$0xff] (!%p524_p9) }
  0x19   : > { %s4661_s26 = smov (!%p524_p9), 112   ;;  %v767_v37 = vld [vmem:[%s6387_s6] sm:$0xff] (!%p524_p9)  ;;  %v4125_v42 = vpack.c.bf16 (!%p524_p9), %v770_v41, %v769_v39  ;;  %v772_v44 = vld [vmem:[%s6387_s6 + $0x28] sm:$0xff] (!%p524_p9)  ;;  %v773_v46 = vld [vmem:[%s6387_s6 + $0x30] sm:$0xff] (!%p524_p9)  ;;  %vm938_vm3 = vcmask (!%p524_p9), 64512  }
  0x1a   : > { %v4122_v40 = vpack.c.bf16 (!%p524_p9), %v768_v38, %v767_v37  ;;  %v771_v43 = vld [vmem:[%s6387_s6 + $0x20] sm:$0xff] (!%p524_p9)  ;;  %v774_v47 = vld [vmem:[%s6387_s6 + $0x38] sm:$0xff] (!%p524_p9) }
  0x1b   : > { %v4128_v45 = vpack.c.bf16 (!%p524_p9), %v772_v44, %v771_v43  ;;  %v4131_v48 = vpack.c.bf16 (!%p524_p9), %v774_v47, %v773_v46  ;;  %v3601_v57 = vld [vmem:[%s6388_s7] ss:$0 sm:$0xff] (!%p524_p9) }
  0x1c   : > { %v679_v0 = vld [vmem:[%s6419_s4] sm:$0xff] (!%p524_p9)  ;;  %v680_v1 = vld [vmem:[%s6419_s4 + $0x8] sm:$0xff] (!%p524_p9)  ;;  %v681_v6 = vld [vmem:[%s6419_s4 + $0x10] sm:$0xff] (!%p524_p9) }
  0x1d   : > { %v590_v2 = vld [vmem:[%s6420_s22] sm:$0xff] (!%p524_p9)  ;;  %v4110_v4 = vpack.c.bf16 (!%p524_p9), %v680_v1, %v679_v0  ;;  %v591_v5 = vld [vmem:[%s6420_s22 + $0x8] sm:$0xff] (!%p524_p9)  ;;  %v682_v7 = vld [vmem:[%s6419_s4 + $0x18] sm:$0xff] (!%p524_p9) }
  0x1e   : > { %v4098_v8 = vpack.c.bf16 %v591_v5, %v590_v2  ;;  %v592_v9 = vld [vmem:[%s6420_s22 + $0x10] sm:$0xff]  ;;  %v593_v10 = vld [vmem:[%s6420_s22 + $0x18] sm:$0xff]  ;;  %v4113_v12 = vpack.c.bf16 %v682_v7, %v681_v6  ;;  %v683_v14 = vld [vmem:[%s6419_s4 + $0x20] sm:$0xff]  ;;  %s581_s20 = scalar_select %p580_p10, %s4781_s0, 1 }
  0x1f   : > { %4111 = vmatpush3.bf16.msra.mxu1 %v4110_v4  ;;  %v4101_v13 = vpack.c.bf16 %v593_v10, %v592_v9  ;;  %v684_v15 = vld [vmem:[%s6419_s4 + $0x28] sm:$0xff]  ;;  %v594_v16 = vld [vmem:[%s6420_s22 + $0x20] sm:$0xff]  ;;  %v685_v20 = vld [vmem:[%s6419_s4 + $0x30] sm:$0xff] }
  0x20   : > { %4099 = vmatpush3.bf16.msra.mxu0 %v4098_v8  ;;  %4112 = vmatprep.subr.bf16.mxu1 %v4658_v3  ;;  %v595_v17 = vld [vmem:[%s6420_s22 + $0x28] sm:$0xff]  ;;  %v4116_v18 = vpack.c.bf16 %v684_v15, %v683_v14  ;;  %v686_v21 = vld [vmem:[%s6419_s4 + $0x38] sm:$0xff]  ;;  %v596_v22 = vld [vmem:[%s6420_s22 + $0x30] sm:$0xff]  ;;  %s3595_s19 = sshll.u32 %s581_s20, 3  ;;  %s4662_s4 = smov 96  }
  0x21   : > { %4100 = vmatprep.subr.bf16.mxu0 %v4658_v3  ;;  %v4104_v19 = vpack.c.bf16 %v595_v17, %v594_v16  ;;  %v597_v23 = vld [vmem:[%s6420_s22 + $0x38] sm:$0xff]  ;;  %v4119_v24 = vpack.c.bf16 %v686_v21, %v685_v20  ;;  %s587_s27 = scalar_lea.vmem %s6421_s1, %s3595_s19  ;;  %s583_s30 = scalar_lea.vmem %s6422_s24, %s3595_s19  ;;  %v855_v15 = vld [vmem:[%s6389_s8 + $0x10] sm:$0xff]  ;;  %v854_v20 = vld [vmem:[%s6389_s8 + $0x8] sm:$0xff] }
  0x22   : > { %v4107_v25 = vpack.c.bf16 %v597_v23, %v596_v22  ;;  %v589_v26 = vld [vmem:[%s587_s27] sm:$0xff]  ;;  %v856_v16 = vld [vmem:[%s6389_s8 + $0x18] sm:$0xff] }
  0x23   : > { %4114 = vmatpush3.bf16.msra.mxu1 %v4113_v12  ;;  %v4878_v27 = vld [vmem:[%s583_s30] sm:$0xff]  ;;  %v4134_v17 = vpack.c.bf16 %v856_v16, %v855_v15 }
  0x24   : > { %4102 = vmatpush3.bf16.msra.mxu0 %v4101_v13  ;;  %4115 = vmatprep.subr.bf16.mxu1 %v4658_v3  ;;  %v857_v44 = vld [vmem:[%s6389_s8 + $0x20] sm:$0xff] }
  0x25   : > { %4103 = vmatprep.subr.bf16.mxu0 %v4658_v3 }
  0x27   : > { %4117 = vmatpush3.bf16.msra.mxu1 %v4116_v18 }
  0x28   : > { %4105 = vmatpush3.bf16.msra.mxu0 %v4104_v19  ;;  %4118 = vmatprep.subr.bf16.mxu1 %v4658_v3  ;;  %v853_v19 = vld [vmem:[%s6389_s8] sm:$0xff] }
  0x29   : > { %4106 = vmatprep.subr.bf16.mxu0 %v4658_v3  ;;  %v4137_v22 = vpack.c.bf16 %v854_v20, %v853_v19 }
  0x2b   : > { %4120 = vmatpush3.bf16.msra.mxu1 %v4119_v24 }
  0x2c   : > { %4108 = vmatpush3.bf16.msra.mxu0 %v4107_v25  ;;  %4029 = vmatprep.subr.mxu1 %v4660_v11 }
  0x2d   : > { %4121 = vmatprep.subr.bf16.mxu0 %v4658_v3 }
  0x2e   : > { %4008 = vmatmul.mubr.msk.f32.vlgmr.msra.gmra.mrb[0].mxu1 %vm605_vm1, %v589_v26 }
  0x2f   : > { %3989 = vmatmul.mubr.msk.f32.vlgmr.msra.gmra.mrb[0].mxu0 %vm605_vm1, %v4878_v27  ;;  %4031 = vmatprep.mubr.msk.f32.mxu1 %vm4659_vm0, %v4660_v11 }
  0x30   : > { %4026 = vmatprep.mubr.msk.f32.mxu0 %vm4659_vm0, %v4660_v11  ;;  %4123 = vmatpush3.bf16.msra.mxu0 %v4122_v40 }
  0x31   : > { %4124 = vmatprep.subr.bf16.mxu0 %v4658_v3 }
  0x34   : > { %4126 = vmatpush3.bf16.msra.mxu0 %v4125_v42 }
  0x35   : > { %4127 = vmatprep.subr.bf16.mxu0 %v4658_v3 }
  0x38   : > { %4129 = vmatpush3.bf16.msra.mxu0 %v4128_v45  ;;  %v858_v45 = vld [vmem:[%s6389_s8 + $0x28] sm:$0xff] }
  0x39   : > { %4130 = vmatprep.subr.bf16.mxu0 %v4658_v3  ;;  %v4140_v46 = vpack.c.bf16 %v858_v45, %v857_v44  ;;  %v1886_v44 = vld [vmem:[%s6393_s12 + $0x110] sm:$0xff] }
  0x3a   : > { %v1902_v45 = vld [vmem:[%s6393_s12 + $0x190] sm:$0xff] }
  0x3c   : > { %4132 = vmatpush3.bf16.msra.mxu0 %v4131_v48 }
  0x3d   : > { %4133 = vmatprep.subr.bf16.mxu0 %v4658_v3 }
  0x3f   : > { %4027 = vmatmul.mubr.msk.f32.vlgmr.msra.gmra.mrb[2].mxu0 %vm605_vm1, %v589_v26 }
  0x40   : > { %4053 = vmatprep.mubr.msk.f32.mxu0 %vm4659_vm0, %v4660_v11  ;;  %4135 = vmatpush3.bf16.msra.mxu0 %v4134_v17 }
  0x41   : > { %4063 = vmatprep.subr.mxu0 %v4660_v11 }
 0x101   : > { %v763_v30 = vpop.f32.mrb[0].mxu1 }
 0x102   : > { %v4895_v31 = vadd.f32 %v3599_v28, %v763_v30  ;;  %v675_v32 = vpop.f32.mrb[0].mxu0  ;;  %v4009_v33 = vpop.f32.mrb[1].mxu1 }
 0x103   : > { %v676_v34 = vadd.f32 %v3597_v29, %v675_v32  ;;  %v3990_v35 = vpop.f32.mrb[1].mxu0 }
 0x104   : > { %1025 = vrot.lane.b32.xlu1 %v4895_v31, %s4661_s26  ;;  %4030 = vmatpush3.xpose.msk.msra.mxu1 %vm861_vm2, %v4895_v31 }
 0x105   : > { %v4901_v36 = vmul.f32 0.25, %v676_v34  ;;  %4034 = vmatprep.subr.mxu1 %v4660_v11 }
 0x107   : > { %4032 = vmatmul.mubr.msk.f32.vlgmr.msra.gmra.mrb[2].mxu1 %vm861_vm2, %v4901_v36 }
 0x108   : > { %1023 = vrot.lane.b32.xlu1 %v4901_v36, %s4661_s26  ;;  %4036 = vmatprep.mubr.msk.f32.mxu1 %vm4659_vm0, %v4660_v11 }
 0x112   : > { %v848_v58 = vpop.f32.mrb[2].mxu0 }
 0x113   : > { %v4946_v59 = vadd.f32 %v3601_v57, %v848_v58  ;;  %v4028_v60 = vpop.f32.mrb[3].mxu0 }
 0x115   : > { %4035 = vmatpush3.msra.mxu1 %v4946_v59 }
 0x116   : > { %4039 = vmatprep.subr.mxu1 %v4660_v11 }
 0x176   : > { %v1026_v63 = vpop.permute.xlu1 %1025 }
 0x17a   : > { %v1024_v1 = vpop.permute.xlu1 %1023 }
 0x1da   : > { %v934_v49 = vpop.f32.mrb[2].mxu1 }
 0x1db   : > { %v4033_v50 = vpop.f32.mrb[3].mxu1  ;;  %v939_v51 = vsel %vm938_vm3, %v934_v49, -inf }
 0x1dc   : > { %940 = vmax.xlane.f32.xlu0 %v939_v51 }
 0x269   : > { %v941_v52 = vpop.xlane.xlu0 %940 }
 0x26a   : > { %v942_v53 = vsub.f32 %v934_v49, %v941_v52 }
 0x26c   : > { %v943_v54 = vmul.f32 1.442695, %v942_v53 }
 0x26e   : > { %4574 = vpow2.f32 %v943_v54 }
 0x278   : > { %v4575_v55 = vpop.eup %4574 }
 0x279   : > { %v945_v56 = vsel %vm938_vm3, %v4575_v55, 0.0 }
 0x27a   : > { %946 = vadd.xlane.f32.xlu0 %v945_v56 }
 0x307   : > { %v947_v61 = vpop.xlane.xlu0 %946 }
 0x308   : > { %4576 = vrcp.f32 %v947_v61 }
 0x312   : > { %v4577_v62 = vpop.eup %4576 }
 0x313   : > { %v949_v0 = vmul.f32 %v4577_v62, %v4575_v55  ;;  %v859_v62 = vld [vmem:[%s6389_s8 + $0x30] sm:$0xff] }
 0x315   : > { %4037 = vmatmul.mubr.msk.f32.vlgmr.msra.gmra.mrb[4].mxu1 %vm938_vm3, %v949_v0 }
 0x316   : > { %4040 = vmatpush3.xpose.msk.msra.mxu1 %vm861_vm2, %v1026_v63  ;;  %4041 = vmatprep.mubr.msk.f32.mxu1 %vm4659_vm0, %v4660_v11  ;;  %v860_v63 = vld [vmem:[%s6389_s8 + $0x38] sm:$0xff] }
 0x317   : > { %4044 = vmatprep.subr.mxu1 %v4660_v11  ;;  %v4143_v0 = vpack.c.bf16 %v860_v63, %v859_v62  ;;  %v1967_v62 = vld [vmem:[%s6393_s12 + $0x398] sm:$0xff]  ;;  %v1948_v63 = vld [vmem:[%s6393_s12 + $0x300] sm:$0xff] }
 0x319   : > { %4042 = vmatmul.mubr.msk.f32.vlgmr.msra.gmra.mrb[6].mxu1 %vm861_vm2, %v1024_v1 }
 0x31a   : > { %4046 = vmatprep.mubr.msk.f32.mxu1 %vm4659_vm0, %v4660_v11 }
 0x3e8   : > { %v1019_v2 = vpop.f32.mrb[4].mxu1 }
 0x3e9   : > { %v4038_v4 = vpop.f32.mrb[5].mxu1 }
 0x3ec   : > { %v1097_v5 = vpop.f32.mrb[6].mxu1 }
 0x3ed   : > { %v4043_v6 = vpop.f32.mrb[7].mxu1  ;;  %v1101_v7 = vsel %vm938_vm3, %v1097_v5, -inf }
 0x3ee   : > { %1102 = vmax.xlane.f32.xlu0 %v1101_v7 }
 0x404   : > { %1113 = vrot.lane.b32.xlu0 %v4946_v59, %s4661_s26  ;;  %s4663_s26 = smov 80  }
 0x408   : > { %1337 = vrot.lane.b32.xlu0 %v4895_v31, %s4662_s4 }
 0x40c   : > { %1335 = vrot.lane.b32.xlu0 %v4901_v36, %s4662_s4 }
 0x47b   : > { %v1103_v8 = vpop.xlane.xlu0 %1102 }
 0x47c   : > { %v1104_v9 = vsub.f32 %v1097_v5, %v1103_v8 }
 0x47e   : > { %v1105_v10 = vmul.f32 1.442695, %v1104_v9 }
 0x47f   : > { %v1114_v12 = vpop.permute.xlu0 %1113 }
 0x480   : > { %4578 = vpow2.f32 %v1105_v10  ;;  %4045 = vmatpush3.msra.mxu1 %v1114_v12  ;;  %v3619_v10 = vld [vmem:[%s6390_s9] ss:$0 sm:$0xff] }
 0x481   : > { %4136 = vmatprep.subr.bf16.mxu1 %v4658_v3 }
 0x483   : > { %v1338_v25 = vpop.permute.xlu0 %1337 }
 0x487   : > { %v1336_v29 = vpop.permute.xlu0 %1335 }
 0x48a   : > { %v4579_v13 = vpop.eup %4578 }
 0x48b   : > { %v1107_v14 = vsel %vm938_vm3, %v4579_v13, 0.0 }
 0x48c   : > { %1108 = vadd.xlane.f32.xlu1 %v1107_v14 }
 0x49d   : > { %1424 = vrot.lane.b32.xlu1 %v4946_v59, %s4662_s4  ;;  %s3634_s4 = sshll.u32 %s4781_s0, 7  ;;  %s4664_s0 = smov [#allocation2]  }
 0x49e   : > { %s6338_s21 = scalar_lea.hbm %s6399_s18, %s3634_s4 }
 0x4a1   : > { %1576 = vrot.lane.b32.xlu1 %v4895_v31, %s4663_s26 }
 0x519   : > { %v1109_v18 = vpop.xlane.xlu1 %1108 }
 0x51a   : > { %4580 = vrcp.f32 %v1109_v18 }
 0x51d   : > { %v1425_v24 = vpop.permute.xlu1 %1424 }
 0x521   : > { %v1577_v47 = vpop.permute.xlu1 %1576 }
 0x524   : > { %v4581_v21 = vpop.eup %4580 }
 0x525   : > { %v1111_v23 = vmul.f32 %v4581_v21, %v4579_v13 }
 0x527   : > { %4047 = vmatmul.mubr.msk.f32.vlgmr.msra.gmra.mrb[8].mxu1 %vm938_vm3, %v1111_v23  ;;  %v1855_v23 = vld [vmem:[%s6393_s12 + $0x18] sm:$0xff] }
 0x528   : > { %4138 = vmatpush3.bf16.msra.mxu1 %v4137_v22  ;;  %4060 = vmatprep.mubr.msk.f32.mxu1 %vm4659_vm0, %v4660_v11  ;;  %v1853_v22 = vld [vmem:[%s6393_s12 + $0x8] sm:$0xff] }
 0x529   : > { %4068 = vmatprep.subr.mxu1 %v4660_v11 }
 0x52b   : > { %4061 = vmatmul.mubr.msk.f32.vlgmr.msra.gmra.mrb[10].mxu1 %vm861_vm2, %v1019_v2 }
 0x52c   : > { %4069 = vmatpush3.msra.mxu1 %v1425_v24  ;;  %4070 = vmatprep.mubr.msk.f32.mxu1 %vm4659_vm0, %v4660_v11 }
 0x52d   : > { %4080 = vmatprep.subr.mxu1 %v4660_v11 }
 0x5fa   : > { %v1185_v26 = vpop.f32.mrb[8].mxu1 }
 0x5fb   : > { %v4048_v28 = vpop.f32.mrb[9].mxu1  ;;  %4054 = vmatmul.mubr.msk.f32.vlgmr.msra.gmra.mrb[4].mxu0 %vm861_vm2, %v1185_v26  ;;  %v1852_v26 = vld [vmem:[%s6393_s12] sm:$0xff] }
 0x5fc   : > { %4064 = vmatpush3.xpose.msk.msra.mxu0 %vm861_vm2, %v1338_v25  ;;  %4065 = vmatprep.mubr.msk.f32.mxu0 %vm4659_vm0, %v4660_v11  ;;  %v1871_v25 = vld [vmem:[%s6393_s12 + $0x98] sm:$0xff]  ;;  %v1868_v28 = vld [vmem:[%s6393_s12 + $0x80] sm:$0xff] }
 0x5fd   : > { %4139 = vmatprep.subr.bf16.mxu0 %v4658_v3 }
 0x5fe   : > { %v1331_v30 = vpop.f32.mrb[10].mxu1 }
 0x5ff   : > { %v4062_v31 = vpop.f32.mrb[11].mxu1  ;;  %4066 = vmatmul.mubr.msk.f32.vlgmr.msra.gmra.mrb[6].mxu0 %vm861_vm2, %v1336_v29  ;;  %v4161_v29 = vpack.c.bf16 %v1871_v25, %v1855_v23  ;;  %v1874_v23 = vld [vmem:[%s6393_s12 + $0xb0] sm:$0xff]  ;;  %v1905_v25 = vld [vmem:[%s6393_s12 + $0x1a8] sm:$0xff] }
 0x600   : > { %4077 = vmatprep.mubr.msk.f32.mxu0 %vm4659_vm0, %v4660_v11  ;;  %4141 = vmatpush3.bf16.msra.mxu0 %v4140_v46  ;;  %v1854_v31 = vld [vmem:[%s6393_s12 + $0x10] sm:$0xff]  ;;  %v4167_v46 = vpack.c.bf16 %v1902_v45, %v1886_v44  ;;  %v1920_v45 = vld [vmem:[%s6393_s12 + $0x220] sm:$0xff] }
 0x601   : > { %4085 = vmatprep.subr.mxu0 %v4660_v11 }
 0x6ce   : > { %v1258_v32 = vpop.f32.mrb[4].mxu0 }
 0x6cf   : > { %v1332_v33 = vadd.f32 %v1331_v30, %v1258_v32  ;;  %v4055_v34 = vpop.f32.mrb[5].mxu0  ;;  %v4147_v30 = vpack.c.bf16 %v1868_v28, %v1852_v26  ;;  %v1870_v32 = vld [vmem:[%s6393_s12 + $0x90] sm:$0xff]  ;;  %v1907_v26 = vld [vmem:[%s6393_s12 + $0x1b8] sm:$0xff] }
 0x6d0   : > { %v1885_v34 = vld [vmem:[%s6393_s12 + $0x108] sm:$0xff] }
 0x6d2   : > { %v1409_v35 = vpop.f32.mrb[6].mxu0 }
 0x6d3   : > { %v4067_v37 = vpop.f32.mrb[7].mxu0  ;;  %v1413_v38 = vsel %vm938_vm3, %v1409_v35, -inf }
 0x6d4   : > { %1414 = vmax.xlane.f32.xlu0 %v1413_v38  ;;  %v1887_v37 = vld [vmem:[%s6393_s12 + $0x118] sm:$0xff] }
 0x761   : > { %v1415_v39 = vpop.xlane.xlu0 %1414 }
 0x762   : > { %v1416_v40 = vsub.f32 %v1409_v35, %v1415_v39  ;;  %v1901_v35 = vld [vmem:[%s6393_s12 + $0x188] sm:$0xff]  ;;  %v1903_v39 = vld [vmem:[%s6393_s12 + $0x198] sm:$0xff] }
 0x763   : > { %v4149_v38 = vpack.c.bf16 %v1901_v35, %v1885_v34 }
 0x764   : > { %v1417_v41 = vmul.f32 1.442695, %v1416_v40  ;;  %v1884_v40 = vld [vmem:[%s6393_s12 + $0x100] sm:$0xff] }
 0x766   : > { %4582 = vpow2.f32 %v1417_v41  ;;  %v1900_v41 = vld [vmem:[%s6393_s12 + $0x180] sm:$0xff] }
 0x770   : > { %v4583_v42 = vpop.eup %4582 }
 0x771   : > { %v1419_v43 = vsel %vm938_vm3, %v4583_v42, 0.0 }
 0x772   : > { %1420 = vadd.xlane.f32.xlu1 %v1419_v43  ;;  %v4151_v43 = vpack.c.bf16 %v1900_v41, %v1884_v40  ;;  %v1937_v40 = vld [vmem:[%s6393_s12 + $0x2a8] sm:$0xff]  ;;  %v1923_v41 = vld [vmem:[%s6393_s12 + $0x238] sm:$0xff] }
 0x783   : > { %1574 = vrot.lane.b32.xlu1 %v4901_v36, %s4663_s26 }
 0x7ff   : > { %v1421_v48 = vpop.xlane.xlu1 %1420 }
 0x800   : > { %4584 = vrcp.f32 %v1421_v48  ;;  %v1933_v48 = vld [vmem:[%s6393_s12 + $0x288] sm:$0xff] }
 0x803   : > { %v1575_v36 = vpop.permute.xlu1 %1574 }
 0x80a   : > { %v4585_v49 = vpop.eup %4584 }
 0x80b   : > { %v1423_v50 = vmul.f32 %v4585_v49, %v4583_v42  ;;  %v4165_v42 = vpack.c.bf16 %v1903_v39, %v1887_v37  ;;  %v1919_v49 = vld [vmem:[%s6393_s12 + $0x218] sm:$0xff]  ;;  %v1890_v37 = vld [vmem:[%s6393_s12 + $0x130] sm:$0xff]  ;;  %v1921_v39 = vld [vmem:[%s6393_s12 + $0x228] sm:$0xff] }
 0x80d   : > { %4071 = vmatmul.mubr.msk.f32.vlgmr.msra.gmra.mrb[12].mxu1 %vm938_vm3, %v1423_v50 }
 0x80e   : > { %4081 = vmatpush3.xpose.msk.msra.mxu1 %vm861_vm2, %v1577_v47  ;;  %4082 = vmatprep.mubr.msk.f32.mxu1 %vm4659_vm0, %v4660_v11  ;;  %v1917_v47 = vld [vmem:[%s6393_s12 + $0x208] sm:$0xff] }
 0x80f   : > { %4142 = vmatprep.subr.bf16.mxu1 %v4658_v3  ;;  %v4153_v50 = vpack.c.bf16 %v1933_v48, %v1917_v47  ;;  %v4185_v47 = vpack.c.bf16 %v1937_v40, %v1921_v39  ;;  %v1959_v39 = vld [vmem:[%s6393_s12 + $0x358] sm:$0xff] }
 0x810   : > { %v1975_v40 = vld [vmem:[%s6393_s12 + $0x3d8] sm:$0xff] }
 0x811   : > { %4083 = vmatmul.mubr.msk.f32.vlgmr.msra.gmra.mrb[14].mxu1 %vm861_vm2, %v1575_v36  ;;  %v1935_v36 = vld [vmem:[%s6393_s12 + $0x298] sm:$0xff] }
 0x812   : > { %4094 = vmatprep.mubr.msk.f32.mxu1 %vm4659_vm0, %v4660_v11  ;;  %4144 = vmatpush3.bf16.msra.mxu1 %v4143_v0  ;;  %v1964_v0 = vld [vmem:[%s6393_s12 + $0x380] sm:$0xff] }
 0x813   : > { %4162 = vmatprep.subr.bf16.mxu1 %v4161_v29 }
 0x8e0   : > { %v1496_v51 = vpop.f32.mrb[12].mxu1 }
 0x8e1   : > { %v4072_v52 = vpop.f32.mrb[13].mxu1  ;;  %4078 = vmatmul.mubr.msk.f32.vlgmr.msra.gmra.mrb[8].mxu0 %vm861_vm2, %v1496_v51  ;;  %v1916_v51 = vld [vmem:[%s6393_s12 + $0x200] sm:$0xff] }
 0x8e2   : > { %4087 = vmatprep.mubr.msk.f32.mxu0 %vm4659_vm0, %v4660_v11  ;;  %v1932_v52 = vld [vmem:[%s6393_s12 + $0x280] sm:$0xff] }
 0x8e4   : > { %v1648_v53 = vpop.f32.mrb[14].mxu1 }
 0x8e5   : > { %v4084_v54 = vpop.f32.mrb[15].mxu1  ;;  %v1652_v55 = vsel %vm938_vm3, %v1648_v53, -inf }
 0x8e6   : > { %1653 = vmax.xlane.f32.xlu0 %v1652_v55  ;;  %v4155_v54 = vpack.c.bf16 %v1932_v52, %v1916_v51  ;;  %v1918_v55 = vld [vmem:[%s6393_s12 + $0x210] sm:$0xff]  ;;  %v1969_v51 = vld [vmem:[%s6393_s12 + $0x3a8] sm:$0xff]  ;;  %v1955_v52 = vld [vmem:[%s6393_s12 + $0x338] sm:$0xff] }
 0x8fc   : > { %1663 = vrot.lane.b32.xlu0 %v4946_v59, %s4663_s26  ;;  %s577_s26 = sand.u32 1, %s4648_s28  }
 0x8fd   : > { %s3594_s29 = sshll.u32 %s577_s26, 3  ;;  %s3506_s1 = scalar_lea.sflag [#allocation3], %s577_s26 }
 0x8fe   : > { %s579_s20 = scalar_lea.vmem [#allocation2], %s3594_s29  ;;  %s4598_s29 = sshll.u32 %s4664_s0, 4  ;;  %s4599_s29 = int_to_ptr.vmem [resolvable:$false] %s4598_s29 }
 0x8ff   : > { %s3519_s30 = sshll.u32 %s579_s20, 4  ;;  %s4600_s23 = scalar_lea.vmem %s4599_s29, 256  ;;  %s6340_s30 = int_to_ptr.vmem [resolvable:$true] %s3519_s30 }
 0x900   : > { %s4594_s27 = scalar_lea.vmem %s6340_s30, 128  ;;  %p4601_p0 = scmp.lt.s32.totalorder %s6340_s30, %s4599_s29 }
 0x901   : > { %p4595_p11 = scmp.ne.s32.totalorder %s6340_s30, %s4594_s27  ;;  %p4602_p1 = scmp.lt.s32.totalorder %s4600_s23, %s4594_s27 }
 0x903   : > { %p4596_p12 = pnand %p4595_p11, %p4798_p5  ;;  %p4603_p2 = por %p4602_p1, %p4601_p0 }
 0x905   : > { %p4597_p13 = pneg %p4596_p12 }
 0x907   : > { %p4604_p3 = pnand %p4603_p2, %p4597_p13 }
 0x973   : > { %v1654_v3 = vpop.xlane.xlu0 %1653 }
 0x974   : > { %v1655_v56 = vsub.f32 %v1648_v53, %v1654_v3  ;;  %v4169_v53 = vpack.c.bf16 %v1935_v36, %v1919_v49  ;;  %v1934_v3 = vld [vmem:[%s6393_s12 + $0x290] sm:$0xff]  ;;  %v1953_v36 = vld [vmem:[%s6393_s12 + $0x328] sm:$0xff] }
 0x975   : > { %v1922_v49 = vld [vmem:[%s6393_s12 + $0x230] sm:$0xff] }
 0x976   : > { %v1656_v57 = vmul.f32 1.442695, %v1655_v56  ;;  %v4171_v56 = vpack.c.bf16 %v1934_v3, %v1918_v55  ;;  %v1952_v3 = vld [vmem:[%s6393_s12 + $0x320] sm:$0xff] }
 0x977   : > { %v1664_v58 = vpop.permute.xlu0 %1663 }
 0x978   : > { %4586 = vpow2.f32 %v1656_v57  ;;  %4086 = vmatpush3.msra.mxu0 %v1664_v58  ;;  %v1949_v57 = vld [vmem:[%s6393_s12 + $0x308] sm:$0xff] }
 0x979   : > { %v1965_v58 = vld [vmem:[%s6393_s12 + $0x388] sm:$0xff] }
 0x982   : > { %v4587_v60 = vpop.eup %4586 }
 0x983   : > { %v1658_v61 = vsel %vm938_vm3, %v4587_v60, 0.0 }
 0x984   : > { %1659 = vadd.xlane.f32.xlu1 %v1658_v61  ;;  %v4157_v61 = vpack.c.bf16 %v1965_v58, %v1949_v57  ;;  %v4189_v57 = vpack.c.bf16 %v1969_v51, %v1953_v36  ;;  %v1867_v36 = vld [vmem:[%s6393_s12 + $0x78] sm:$0xff] }
 0x985   : > { %v1883_v51 = vld [vmem:[%s6393_s12 + $0xf8] sm:$0xff] }
 0x9b4   : > { %v1569_v59 = vpop.f32.mrb[8].mxu0 }
 0x9b5   : > { %v1573_v1 = vadd.f32 %v1569_v59, %v1332_v33  ;;  %v4079_v2 = vpop.f32.mrb[9].mxu0  ;;  %v4163_v33 = vpack.c.bf16 %v1870_v32, %v1854_v31  ;;  %v1888_v31 = vld [vmem:[%s6393_s12 + $0x120] sm:$0xff] }
 0x9b6   : > { %v1950_v2 = vld [vmem:[%s6393_s12 + $0x310] sm:$0xff]  ;;  %v1904_v32 = vld [vmem:[%s6393_s12 + $0x1a0] sm:$0xff] }
 0xa11   : > { %v1660_v4 = vpop.xlane.xlu1 %1659 }
 0xa12   : > { %4588 = vrcp.f32 %v1660_v4  ;;  %v1966_v4 = vld [vmem:[%s6393_s12 + $0x390] sm:$0xff] }
 0xa1c   : > { %v4589_v5 = vpop.eup %4588 }
 0xa1d   : > { %v1662_v6 = vmul.f32 %v4589_v5, %v4587_v60  ;;  %v1951_v60 = vld [vmem:[%s6393_s12 + $0x318] sm:$0xff]  ;;  %v4175_v5 = vpack.c.bf16 %v1966_v4, %v1950_v2  ;;  %v1860_v4 = vld [vmem:[%s6393_s12 + $0x40] sm:$0xff] }
 0xa1e   : > { %v4173_v59 = vpack.c.bf16 %v1967_v62, %v1951_v60  ;;  %v1954_v60 = vld [vmem:[%s6393_s12 + $0x330] sm:$0xff]  ;;  %v1861_v62 = vld [vmem:[%s6393_s12 + $0x48] sm:$0xff] }
 0xa1f   : > { %4088 = vmatmul.mubr.msk.f32.vlgmr.msra.gmra.mrb[10].mxu0 %vm938_vm3, %v1662_v6  ;;  %v1857_v6 = vld [vmem:[%s6393_s12 + $0x28] sm:$0xff] }
 0xa20   : > { %2131 = vmatprep.mubr.f32.mxu0 %v4660_v11 }
 0xaf2   : > { %v1735_v7 = vpop.f32.mrb[10].mxu0 }
 0xaf3   : > { %v4089_v8 = vpop.f32.mrb[11].mxu0  ;;  %4095 = vmatmul.mubr.msk.f32.vlgmr.msra.gmra.mrb[16].mxu1 %vm861_vm2, %v1735_v7  ;;  %v1873_v7 = vld [vmem:[%s6393_s12 + $0xa8] sm:$0xff] }
 0xaf4   : > { %2202 = vmatprep.mubr.f32.mxu1 %v4660_v11  ;;  %4164 = vmatpush1.bf16.msra.mxu1 %v4163_v33  ;;  %v1859_v8 = vld [vmem:[%s6393_s12 + $0x38] sm:$0xff] }
 0xaf5   : > { %4166 = vmatprep.subr.bf16.mxu1 %v4165_v42  ;;  %v1939_v42 = vld [vmem:[%s6393_s12 + $0x2b8] sm:$0xff] }
 0xaf6   : > { %v4201_v48 = vpack.c.bf16 %v1939_v42, %v1923_v41 }
 0xaf8   : > { %4168 = vmatpush1.bf16.msra.mxu1 %v4167_v46  ;;  %v1936_v46 = vld [vmem:[%s6393_s12 + $0x2a0] sm:$0xff] }
 0xaf9   : > { %4170 = vmatprep.subr.bf16.mxu1 %v4169_v53  ;;  %v1971_v53 = vld [vmem:[%s6393_s12 + $0x3b8] sm:$0xff] }
 0xafa   : > { %v4205_v58 = vpack.c.bf16 %v1971_v53, %v1955_v52 }
 0xafc   : > { %4172 = vmatpush1.bf16.msra.mxu1 %v4171_v56  ;;  %v1968_v56 = vld [vmem:[%s6393_s12 + $0x3a0] sm:$0xff] }
 0xafd   : > { %4174 = vmatprep.subr.bf16.mxu1 %v4173_v59  ;;  %v1879_v59 = vld [vmem:[%s6393_s12 + $0xd8] sm:$0xff] }
 0xb00   : > { %4176 = vmatpush1.bf16.msra.mxu1 %v4175_v5  ;;  %v1876_v5 = vld [vmem:[%s6393_s12 + $0xc0] sm:$0xff] }
 0xbc6   : > { %v1808_v9 = vpop.f32.mrb[16].mxu1 }
 0xbc7   : > { %v1812_v12 = vadd.f32 %v1808_v9, %v1573_v1  ;;  %v4096_v13 = vpop.f32.mrb[17].mxu1  ;;  %v4159_v1 = vpack.c.bf16 %v1964_v0, %v1948_v63  ;;  %v4177_v9 = vpack.c.bf16 %v1873_v7, %v1857_v6  ;;  %v1877_v63 = vld [vmem:[%s6393_s12 + $0xc8] sm:$0xff]  ;;  %v1863_v0 = vld [vmem:[%s6393_s12 + $0x58] sm:$0xff] }
 0xbc8   : > { %v4209_v6 = vpack.c.bf16 %v1877_v63, %v1861_v62  ;;  %v4225_v7 = vpack.c.bf16 %v1879_v59, %v1863_v0  ;;  %v1899_v62 = vld [vmem:[%s6393_s12 + $0x178] sm:$0xff] }
 0xbc9   : > { %v1820_v14 = vadd.f32 %v3619_v10, %v1812_v12  ;;  %v1875_v10 = vld [vmem:[%s6393_s12 + $0xb8] sm:$0xff] }
 0xbca   : > { %v4193_v12 = vpack.c.bf16 %v1875_v10, %v1859_v8  ;;  %v1862_v8 = vld [vmem:[%s6393_s12 + $0x50] sm:$0xff]  ;;  %v1893_v10 = vld [vmem:[%s6393_s12 + $0x148] sm:$0xff]  ;;  %v1915_v63 = vld [vmem:[%s6393_s12 + $0x1f8] sm:$0xff] }
 0xbcb   : > { %v1821_v15 = vadd.f32 %v1820_v14, %v4878_v27  ;;  %v1869_v27 = vld [vmem:[%s6393_s12 + $0x88] sm:$0xff] }
 0xbcc   : > { %v4145_v24 = vpack.c.bf16 %v1869_v27, %v1853_v22  ;;  %4194 = vmatprep.subr.bf16.mxu1 %v4193_v12  ;;  %v1858_v27 = vld [vmem:[%s6393_s12 + $0x30] sm:$0xff]  ;;  %v1909_v12 = vld [vmem:[%s6393_s12 + $0x1c8] sm:$0xff] }
 0xbcd   : > { %v1824_v16 = vsel %vm605_vm1, %v1821_v15, 0.0 }
 0xbce   : > { %1825 = vadd.xlane.f32.xlu0 %v1824_v16  ;;  %4146 = vmatprep.subr.bf16.mxu0 %v4145_v24  ;;  %v3620_v16 = vld [vmem:[%s6391_s10] ss:$0 sm:$0xff]  ;;  %v1889_v24 = vld [vmem:[%s6393_s12 + $0x128] sm:$0xff] }
 0xbcf   : > { %4148 = vmatpush1.bf16.msra.mxu0 %v4147_v30  ;;  %v4195_v30 = vpack.c.bf16 %v1874_v23, %v1858_v27  ;;  %v4181_v34 = vpack.c.bf16 %v1905_v25, %v1889_v24  ;;  %v1910_v27 = vld [vmem:[%s6393_s12 + $0x1d0] sm:$0xff]  ;;  %v1925_v23 = vld [vmem:[%s6393_s12 + $0x248] sm:$0xff]  ;;  %v1927_v25 = vld [vmem:[%s6393_s12 + $0x258] sm:$0xff] }
 0xbd0   : > { %4150 = vmatprep.subr.bf16.mxu0 %v4149_v38  ;;  %v1906_v38 = vld [vmem:[%s6393_s12 + $0x1b0] sm:$0xff]  ;;  %v1941_v24 = vld [vmem:[%s6393_s12 + $0x2c8] sm:$0xff] }
 0xbd1   : > { %v4199_v44 = vpack.c.bf16 %v1906_v38, %v1890_v37  ;;  %v1957_v37 = vld [vmem:[%s6393_s12 + $0x348] sm:$0xff] }
 0xbd2   : > { %v1973_v38 = vld [vmem:[%s6393_s12 + $0x3c8] sm:$0xff] }
 0xbd3   : > { %4152 = vmatpush1.bf16.msra.mxu0 %v4151_v43  ;;  %v4183_v43 = vpack.c.bf16 %v1904_v32, %v1888_v31  ;;  %v4217_v31 = vpack.c.bf16 %v1941_v24, %v1925_v23  ;;  %v1963_v23 = vld [vmem:[%s6393_s12 + $0x378] sm:$0xff] }
 0xbd4   : > { %4154 = vmatprep.subr.bf16.mxu0 %v4153_v50  ;;  %v1938_v50 = vld [vmem:[%s6393_s12 + $0x2b0] sm:$0xff]  ;;  %v1979_v24 = vld [vmem:[%s6393_s12 + $0x3f8] sm:$0xff] }
 0xbd5   : > { %v4203_v55 = vpack.c.bf16 %v1938_v50, %v1922_v49  ;;  %v1865_v49 = vld [vmem:[%s6393_s12 + $0x68] sm:$0xff] }
 0xbd6   : > { %v1881_v50 = vld [vmem:[%s6393_s12 + $0xe8] sm:$0xff] }
 0xbd7   : > { %4156 = vmatpush1.bf16.msra.mxu0 %v4155_v54  ;;  %v4187_v54 = vpack.c.bf16 %v1936_v46, %v1920_v45  ;;  %v4221_v45 = vpack.c.bf16 %v1973_v38, %v1957_v37  ;;  %v4237_v46 = vpack.c.bf16 %v1975_v40, %v1959_v39  ;;  %v2700_v37 = vld [vmem:[%s6395_s14 + $0x188] sm:$0xff]  ;;  %v2651_v40 = vld [vmem:[%s6395_s14] sm:$0xff] }
 0xbd8   : > { %4158 = vmatprep.subr.bf16.mxu0 %v4157_v61  ;;  %v1970_v61 = vld [vmem:[%s6393_s12 + $0x3b0] sm:$0xff] }
 0xbd9   : > { %v4207_v2 = vpack.c.bf16 %v1970_v61, %v1954_v60  ;;  %v1897_v60 = vld [vmem:[%s6393_s12 + $0x168] sm:$0xff] }
 0xbda   : > { %v1913_v61 = vld [vmem:[%s6393_s12 + $0x1e8] sm:$0xff] }
 0xbdb   : > { %4160 = vmatpush1.bf16.msra.mxu0 %v4159_v1  ;;  %v4191_v1 = vpack.c.bf16 %v1968_v56, %v1952_v3  ;;  %v4241_v3 = vpack.c.bf16 %v1881_v50, %v1865_v49  ;;  %v4257_v56 = vpack.c.bf16 %v1883_v51, %v1867_v36  ;;  %v2702_v49 = vld [vmem:[%s6395_s14 + $0x198] sm:$0xff]  ;;  %v2653_v51 = vld [vmem:[%s6395_s14 + $0x10] sm:$0xff] }
 0xbdc   : > { %4178 = vmatprep.subr.bf16.mxu0 %v4177_v9  ;;  %v1878_v9 = vld [vmem:[%s6393_s12 + $0xd0] sm:$0xff] }
 0xc5b   : > { %v1826_v17 = vpop.xlane.xlu0 %1825 }
 0xc5c   : > { %v1828_v18 = vmul.f32 0.015625, %v1826_v17 }
 0xc5e   : > { %v5038_v19 = vsub.f32 %v1821_v15, %v1828_v18  ;;  %v3621_v18 = vld [vmem:[%s6392_s11] ss:$0 sm:$0xff] }
 0xc60   : > { %v1830_v20 = vmul.f32 %v5038_v19, %v5038_v19 }
 0xc62   : > { %v1831_v21 = vsel %vm605_vm1, %v1830_v20, 0.0  ;;  %v1856_v20 = vld [vmem:[%s6393_s12 + $0x20] sm:$0xff] }
 0xc63   : > { %1832 = vadd.xlane.f32.xlu1 %v1831_v21  ;;  %v1872_v21 = vld [vmem:[%s6393_s12 + $0xa0] sm:$0xff] }
 0xc64   : > { %v4179_v29 = vpack.c.bf16 %v1872_v21, %v1856_v20  ;;  %v4213_v20 = vpack.c.bf16 %v1909_v12, %v1893_v10  ;;  %v1931_v10 = vld [vmem:[%s6393_s12 + $0x278] sm:$0xff] }
 0xc65   : > { %v1947_v12 = vld [vmem:[%s6393_s12 + $0x2f8] sm:$0xff] }
 0xcf0   : > { %v1833_v13 = vpop.xlane.xlu1 %1832 }
 0xcf1   : > { %v1834_v14 = vmul.f32 0.015625, %v1833_v13  ;;  %v1895_v13 = vld [vmem:[%s6393_s12 + $0x158] sm:$0xff] }
 0xcf3   : > { %v1835_v15 = vadd.f32 1e-05, %v1834_v14  ;;  %v1911_v14 = vld [vmem:[%s6393_s12 + $0x1d8] sm:$0xff] }
 0xcf4   : > { %v4229_v21 = vpack.c.bf16 %v1911_v14, %v1895_v13 }
 0xcf5   : > { %4590 = vrsqrt.f32 %v1835_v15  ;;  %v4211_v15 = vpack.c.bf16 %v1876_v5, %v1860_v4  ;;  %v4245_v4 = vpack.c.bf16 %v1913_v61, %v1897_v60  ;;  %v4261_v5 = vpack.c.bf16 %v1915_v63, %v1899_v62  ;;  %v2704_v60 = vld [vmem:[%s6395_s14 + $0x1a8] sm:$0xff]  ;;  %v2655_v63 = vld [vmem:[%s6395_s14 + $0x20] sm:$0xff] }
 0xcff   : > { %v4591_v17 = vpop.eup %4590 }
 0xd00   : > { %v1837_v22 = vmul.f32 %v4591_v17, %v5038_v19  ;;  %v1891_v19 = vld [vmem:[%s6393_s12 + $0x138] sm:$0xff]  ;;  %v1892_v17 = vld [vmem:[%s6393_s12 + $0x140] sm:$0xff] }
 0xd01   : > { %v4197_v35 = vpack.c.bf16 %v1907_v26, %v1891_v19  ;;  %v1943_v19 = vld [vmem:[%s6393_s12 + $0x2d8] sm:$0xff] }
 0xd02   : > { %v1844_v28 = vmul.f32 %v3620_v16, %v1837_v22  ;;  %v4227_v16 = vpack.c.bf16 %v1878_v9, %v1862_v8  ;;  %v1894_v22 = vld [vmem:[%s6393_s12 + $0x150] sm:$0xff]  ;;  %v4233_v32 = vpack.c.bf16 %v1943_v19, %v1927_v25  ;;  %v1929_v8 = vld [vmem:[%s6393_s12 + $0x268] sm:$0xff] }
 0xd03   : > { %v1945_v9 = vld [vmem:[%s6393_s12 + $0x2e8] sm:$0xff] }
 0xd04   : > { %v5188_v33 = vadd.f32 %v3621_v18, %v1844_v28  ;;  %v1908_v18 = vld [vmem:[%s6393_s12 + $0x1c0] sm:$0xff]  ;;  %v4231_v28 = vpack.c.bf16 %v1910_v27, %v1894_v22  ;;  %v1961_v22 = vld [vmem:[%s6393_s12 + $0x368] sm:$0xff] }
 0xd05   : > { %v4215_v26 = vpack.c.bf16 %v1908_v18, %v1892_v17  ;;  %v4249_v17 = vpack.c.bf16 %v1945_v9, %v1929_v8  ;;  %v4265_v18 = vpack.c.bf16 %v1947_v12, %v1931_v10  ;;  %v1977_v27 = vld [vmem:[%s6393_s12 + $0x3e8] sm:$0xff]  ;;  %v2706_v8 = vld [vmem:[%s6395_s14 + $0x1b8] sm:$0xff]  ;;  %v2657_v12 = vld [vmem:[%s6395_s14 + $0x30] sm:$0xff] }
 0xd06   : > { %3622 = vmatmul.mubr.msk.f32.vlgmr.msra.gmra.mrb[12].mxu0 %vm605_vm1, %v5188_v33  ;;  %3623 = vmatmul.mubr.msk.f32.vlgmr.msra.gmra.mrb[18].mxu1 %vm605_vm1, %v5188_v33 }
 0xd07   : > { %4180 = vmatpush1.bf16.msra.mxu0 %v4179_v29  ;;  %4196 = vmatpush1.bf16.msra.mxu1 %v4195_v30  ;;  %v1924_v29 = vld [vmem:[%s6393_s12 + $0x240] sm:$0xff] }
 0xd08   : > { %4182 = vmatprep.subr.bf16.mxu0 %v4181_v34  ;;  %4198 = vmatprep.subr.bf16.mxu1 %v4197_v35  ;;  %v1940_v30 = vld [vmem:[%s6393_s12 + $0x2c0] sm:$0xff]  ;;  %v1926_v34 = vld [vmem:[%s6393_s12 + $0x250] sm:$0xff] }
 0xd09   : > { %2273 = vmatprep.mubr.f32.mxu0 %v4660_v11  ;;  %2344 = vmatprep.mubr.f32.mxu1 %v4660_v11  ;;  %v1942_v35 = vld [vmem:[%s6393_s12 + $0x2d0] sm:$0xff]  ;;  %v4219_v41 = vpack.c.bf16 %v1940_v30, %v1924_v29  ;;  %v4253_v29 = vpack.c.bf16 %v1977_v27, %v1961_v22  ;;  %v4269_v30 = vpack.c.bf16 %v1979_v24, %v1963_v23  ;;  %v2708_v22 = vld [vmem:[%s6395_s14 + $0x1c8] sm:$0xff]  ;;  %v2659_v24 = vld [vmem:[%s6395_s14 + $0x40] sm:$0xff] }
 0xd0a   : > { %v4235_v42 = vpack.c.bf16 %v1942_v35, %v1926_v34  ;;  %v2668_v34 = vld [vmem:[%s6395_s14 + $0x88] sm:$0xff]  ;;  %v2699_v35 = vld [vmem:[%s6395_s14 + $0x180] sm:$0xff] }
 0xd0b   : > { %4184 = vmatpush1.bf16.msra.mxu0 %v4183_v43  ;;  %4200 = vmatpush1.bf16.msra.mxu1 %v4199_v44  ;;  %v1956_v43 = vld [vmem:[%s6393_s12 + $0x340] sm:$0xff] }
 0xd0c   : > { %4186 = vmatprep.subr.bf16.mxu0 %v4185_v47  ;;  %4202 = vmatprep.subr.bf16.mxu1 %v4201_v48  ;;  %v1972_v44 = vld [vmem:[%s6393_s12 + $0x3c0] sm:$0xff]  ;;  %v1958_v47 = vld [vmem:[%s6393_s12 + $0x350] sm:$0xff] }
 0xd0d   : > { %v1974_v48 = vld [vmem:[%s6393_s12 + $0x3d0] sm:$0xff]  ;;  %v4223_v52 = vpack.c.bf16 %v1972_v44, %v1956_v43  ;;  %v4305_v43 = vpack.c.bf16 %v2700_v37, %v2699_v35  ;;  %v2683_v44 = vld [vmem:[%s6395_s14 + $0x100] sm:$0xff] }
 0xd0e   : > { %v4239_v53 = vpack.c.bf16 %v1974_v48, %v1958_v47  ;;  %v2670_v47 = vld [vmem:[%s6395_s14 + $0x98] sm:$0xff]  ;;  %v2701_v48 = vld [vmem:[%s6395_s14 + $0x190] sm:$0xff] }
 0xd0f   : > { %4188 = vmatpush1.bf16.msra.mxu0 %v4187_v54  ;;  %4204 = vmatpush1.bf16.msra.mxu1 %v4203_v55  ;;  %v1864_v54 = vld [vmem:[%s6393_s12 + $0x60] sm:$0xff]  ;;  %v2661_v37 = vld [vmem:[%s6395_s14 + $0x50] sm:$0xff] }
 0xd10   : > { %4190 = vmatprep.subr.bf16.mxu0 %v4189_v57  ;;  %4206 = vmatprep.subr.bf16.mxu1 %v4205_v58  ;;  %v1880_v55 = vld [vmem:[%s6393_s12 + $0xe0] sm:$0xff]  ;;  %v1866_v57 = vld [vmem:[%s6393_s12 + $0x70] sm:$0xff] }
 0xd11   : > { %v1882_v58 = vld [vmem:[%s6393_s12 + $0xf0] sm:$0xff]  ;;  %v4243_v0 = vpack.c.bf16 %v1880_v55, %v1864_v54  ;;  %v4309_v54 = vpack.c.bf16 %v2702_v49, %v2701_v48  ;;  %v2663_v49 = vld [vmem:[%s6395_s14 + $0x60] sm:$0xff] }
 0xd12   : > { %v4259_v59 = vpack.c.bf16 %v1882_v58, %v1866_v57  ;;  %v2685_v55 = vld [vmem:[%s6395_s14 + $0x110] sm:$0xff]  ;;  %v2672_v57 = vld [vmem:[%s6395_s14 + $0xa8] sm:$0xff]  ;;  %v2703_v58 = vld [vmem:[%s6395_s14 + $0x1a0] sm:$0xff] }
 0xd13   : > { %4192 = vmatpush1.bf16.msra.mxu0 %v4191_v1  ;;  %4208 = vmatpush1.bf16.msra.mxu1 %v4207_v2  ;;  %v1896_v1 = vld [vmem:[%s6393_s12 + $0x160] sm:$0xff] }
 0xd14   : > { %4210 = vmatprep.subr.bf16.mxu0 %v4209_v6  ;;  %4226 = vmatprep.subr.bf16.mxu1 %v4225_v7  ;;  %v1912_v2 = vld [vmem:[%s6393_s12 + $0x1e0] sm:$0xff]  ;;  %v1898_v6 = vld [vmem:[%s6393_s12 + $0x170] sm:$0xff] }
 0xd15   : > { %v1914_v7 = vld [vmem:[%s6393_s12 + $0x1f0] sm:$0xff]  ;;  %v4247_v13 = vpack.c.bf16 %v1912_v2, %v1896_v1  ;;  %v4313_v1 = vpack.c.bf16 %v2704_v60, %v2703_v58  ;;  %v2687_v2 = vld [vmem:[%s6395_s14 + $0x120] sm:$0xff]  ;;  %v2714_v60 = vld [vmem:[%s6395_s14 + $0x1f8] sm:$0xff] }
 0xd16   : > { %3624 = vmatmul.mubr.msk.f32.vlgmr.msra.gmra.mrb[14].mxu0 %vm605_vm1, %v5188_v33  ;;  %3625 = vmatmul.mubr.msk.f32.vlgmr.msra.gmra.mrb[20].mxu1 %vm605_vm1, %v5188_v33  ;;  %v4263_v14 = vpack.c.bf16 %v1914_v7, %v1898_v6  ;;  %v2674_v6 = vld [vmem:[%s6395_s14 + $0xb8] sm:$0xff]  ;;  %v2705_v7 = vld [vmem:[%s6395_s14 + $0x1b0] sm:$0xff] }
 0xd17   : > { %4212 = vmatpush1.bf16.msra.mxu0 %v4211_v15  ;;  %4228 = vmatpush1.bf16.msra.mxu1 %v4227_v16  ;;  %v1928_v15 = vld [vmem:[%s6393_s12 + $0x260] sm:$0xff] }
 0xd18   : > { %4214 = vmatprep.subr.bf16.mxu0 %v4213_v20  ;;  %4230 = vmatprep.subr.bf16.mxu1 %v4229_v21  ;;  %v1944_v16 = vld [vmem:[%s6393_s12 + $0x2e0] sm:$0xff]  ;;  %v1930_v20 = vld [vmem:[%s6393_s12 + $0x270] sm:$0xff] }
 0xd19   : > { %2415 = vmatprep.mubr.f32.mxu0 %v4660_v11  ;;  %2486 = vmatprep.mubr.f32.mxu1 %v4660_v11  ;;  %v1946_v21 = vld [vmem:[%s6393_s12 + $0x2f0] sm:$0xff]  ;;  %v4251_v25 = vpack.c.bf16 %v1944_v16, %v1928_v15  ;;  %v4317_v15 = vpack.c.bf16 %v2706_v8, %v2705_v7  ;;  %v2764_v8 = vld [vmem:[%s6395_s14 + $0x388] sm:$0xff] }
 0xd1a   : > { %v4267_v19 = vpack.c.bf16 %v1946_v21, %v1930_v20  ;;  %v2689_v16 = vld [vmem:[%s6395_s14 + $0x130] sm:$0xff]  ;;  %v2676_v20 = vld [vmem:[%s6395_s14 + $0xc8] sm:$0xff]  ;;  %v2707_v21 = vld [vmem:[%s6395_s14 + $0x1c0] sm:$0xff] }
 0xd1b   : > { %4216 = vmatpush1.bf16.msra.mxu0 %v4215_v26  ;;  %4232 = vmatpush1.bf16.msra.mxu1 %v4231_v28  ;;  %v1960_v26 = vld [vmem:[%s6393_s12 + $0x360] sm:$0xff] }
 0xd1c   : > { %4218 = vmatprep.subr.bf16.mxu0 %v4217_v31  ;;  %4234 = vmatprep.subr.bf16.mxu1 %v4233_v32  ;;  %v1976_v28 = vld [vmem:[%s6393_s12 + $0x3e0] sm:$0xff]  ;;  %v1978_v31 = vld [vmem:[%s6393_s12 + $0x3f0] sm:$0xff] }
 0xd1d   : > { %v2667_v32 = vld [vmem:[%s6395_s14 + $0x80] sm:$0xff]  ;;  %v4255_v38 = vpack.c.bf16 %v1976_v28, %v1960_v26  ;;  %v4321_v26 = vpack.c.bf16 %v2708_v22, %v2707_v21 }
 0xd1e   : > { %v2691_v28 = vld [vmem:[%s6395_s14 + $0x140] sm:$0xff] }
 0xd1f   : > { %4220 = vmatpush1.bf16.msra.mxu0 %v4219_v41  ;;  %4236 = vmatpush1.bf16.msra.mxu1 %v4235_v42  ;;  %v2652_v41 = vld [vmem:[%s6395_s14 + $0x8] sm:$0xff]  ;;  %v4273_v42 = vpack.c.bf16 %v2668_v34, %v2667_v32  ;;  %v2710_v32 = vld [vmem:[%s6395_s14 + $0x1d8] sm:$0xff] }
 0xd20   : > { %4222 = vmatprep.subr.bf16.mxu0 %v4221_v45  ;;  %4238 = vmatprep.subr.bf16.mxu1 %v4237_v46  ;;  %v2684_v45 = vld [vmem:[%s6395_s14 + $0x108] sm:$0xff]  ;;  %v2669_v46 = vld [vmem:[%s6395_s14 + $0x90] sm:$0xff]  ;;  %v4275_v50 = vpack.c.bf16 %v2652_v41, %v2651_v40 }
 0xd21   : > { %v4307_v36 = vpack.c.bf16 %v2684_v45, %v2683_v44  ;;  %v2693_v41 = vld [vmem:[%s6395_s14 + $0x150] sm:$0xff]  ;;  %v2680_v44 = vld [vmem:[%s6395_s14 + $0xe8] sm:$0xff]  ;;  %v2711_v45 = vld [vmem:[%s6395_s14 + $0x1e0] sm:$0xff] }
 0xd23   : > { %4224 = vmatpush1.bf16.msra.mxu0 %v4223_v52  ;;  %4240 = vmatpush1.bf16.msra.mxu1 %v4239_v53  ;;  %v2654_v52 = vld [vmem:[%s6395_s14 + $0x18] sm:$0xff]  ;;  %v4277_v53 = vpack.c.bf16 %v2670_v47, %v2669_v46  ;;  %v2712_v46 = vld [vmem:[%s6395_s14 + $0x1e8] sm:$0xff] }
 0xd24   : > { %4242 = vmatprep.subr.bf16.mxu0 %v4241_v3  ;;  %4258 = vmatprep.subr.bf16.mxu1 %v4257_v56  ;;  %v2686_v3 = vld [vmem:[%s6395_s14 + $0x118] sm:$0xff]  ;;  %v2671_v56 = vld [vmem:[%s6395_s14 + $0xa0] sm:$0xff]  ;;  %v4279_v61 = vpack.c.bf16 %v2654_v52, %v2653_v51  ;;  %v2664_v51 = vld [vmem:[%s6395_s14 + $0x68] sm:$0xff] }
 0xd25   : > { %v4311_v62 = vpack.c.bf16 %v2686_v3, %v2685_v55  ;;  %v2695_v52 = vld [vmem:[%s6395_s14 + $0x160] sm:$0xff]  ;;  %v2681_v3 = vld [vmem:[%s6395_s14 + $0xf0] sm:$0xff] }
 0xd26   : > { %3626 = vmatmul.mubr.msk.f32.vlgmr.msra.gmra.mrb[16].mxu0 %vm605_vm1, %v5188_v33  ;;  %3627 = vmatmul.mubr.msk.f32.vlgmr.msra.gmra.mrb[22].mxu1 %vm605_vm1, %v5188_v33 }
 0xd27   : > { %4244 = vmatpush1.bf16.msra.mxu0 %v4243_v0  ;;  %4260 = vmatpush1.bf16.msra.mxu1 %v4259_v59  ;;  %v2656_v0 = vld [vmem:[%s6395_s14 + $0x28] sm:$0xff]  ;;  %v4281_v59 = vpack.c.bf16 %v2672_v57, %v2671_v56  ;;  %v2682_v56 = vld [vmem:[%s6395_s14 + $0xf8] sm:$0xff]  ;;  %v2713_v57 = vld [vmem:[%s6395_s14 + $0x1f0] sm:$0xff] }
 0xd28   : > { %4246 = vmatprep.subr.bf16.mxu0 %v4245_v4  ;;  %4262 = vmatprep.subr.bf16.mxu1 %v4261_v5  ;;  %v2688_v4 = vld [vmem:[%s6395_s14 + $0x128] sm:$0xff]  ;;  %v2673_v5 = vld [vmem:[%s6395_s14 + $0xb0] sm:$0xff]  ;;  %v4283_v9 = vpack.c.bf16 %v2656_v0, %v2655_v63  ;;  %v4301_v58 = vpack.c.bf16 %v2682_v56, %v2681_v3  ;;  %v4333_v63 = vpack.c.bf16 %v2714_v60, %v2713_v57 }
 0xd29   : > { %2557 = vmatprep.mubr.f32.mxu0 %v4660_v11  ;;  %2628 = vmatprep.mubr.f32.mxu1 %v4660_v11  ;;  %v1962_v11 = vld [vmem:[%s6393_s12 + $0x370] sm:$0xff]  ;;  %v4315_v10 = vpack.c.bf16 %v2688_v4, %v2687_v2  ;;  %v2731_v4 = vld [vmem:[%s6395_s14 + $0x280] sm:$0xff]  ;;  %v2768_v3 = vld [vmem:[%s6395_s14 + $0x3a8] sm:$0xff] }
 0xd2a   : > { %v4271_v39 = vpack.c.bf16 %v1978_v31, %v1962_v11  ;;  %v2678_v11 = vld [vmem:[%s6395_s14 + $0xd8] sm:$0xff]  ;;  %v2709_v31 = vld [vmem:[%s6395_s14 + $0x1d0] sm:$0xff]  ;;  %v2720_v60 = vld [vmem:[%s6395_s14 + $0x228] sm:$0xff] }
 0xd2b   : > { %4248 = vmatpush1.bf16.msra.mxu0 %v4247_v13  ;;  %4264 = vmatpush1.bf16.msra.mxu1 %v4263_v14  ;;  %v2658_v13 = vld [vmem:[%s6395_s14 + $0x38] sm:$0xff]  ;;  %v4285_v14 = vpack.c.bf16 %v2674_v6, %v2673_v5  ;;  %v4325_v40 = vpack.c.bf16 %v2710_v32, %v2709_v31  ;;  %v2732_v5 = vld [vmem:[%s6395_s14 + $0x288] sm:$0xff]  ;;  %v2763_v6 = vld [vmem:[%s6395_s14 + $0x380] sm:$0xff] }
 0xd2c   : > { %4250 = vmatprep.subr.bf16.mxu0 %v4249_v17  ;;  %4266 = vmatprep.subr.bf16.mxu1 %v4265_v18  ;;  %v2690_v17 = vld [vmem:[%s6395_s14 + $0x138] sm:$0xff]  ;;  %v2675_v18 = vld [vmem:[%s6395_s14 + $0xc0] sm:$0xff]  ;;  %v4287_v27 = vpack.c.bf16 %v2658_v13, %v2657_v12  ;;  %v4337_v7 = vpack.c.bf16 %v2732_v5, %v2731_v4  ;;  %v2769_v5 = vld [vmem:[%s6395_s14 + $0x3b0] sm:$0xff] }
 0xd2d   : > { %v4319_v23 = vpack.c.bf16 %v2690_v17, %v2689_v16  ;;  %v2747_v32 = vld [vmem:[%s6395_s14 + $0x300] sm:$0xff]  ;;  %v2738_v4 = vld [vmem:[%s6395_s14 + $0x2b8] sm:$0xff] }
 0xd2f   : > { %4252 = vmatpush1.bf16.msra.mxu0 %v4251_v25  ;;  %4268 = vmatpush1.bf16.msra.mxu1 %v4267_v19  ;;  %v2660_v25 = vld [vmem:[%s6395_s14 + $0x48] sm:$0xff]  ;;  %v4289_v19 = vpack.c.bf16 %v2676_v20, %v2675_v18  ;;  %v5680_v18 = vld [vmem:[%s6394_s13] sm:$0xff] }
 0xd30   : > { %4254 = vmatprep.subr.bf16.mxu0 %v4253_v29  ;;  %4270 = vmatprep.subr.bf16.mxu1 %v4269_v30  ;;  %v2692_v29 = vld [vmem:[%s6395_s14 + $0x148] sm:$0xff]  ;;  %v2677_v30 = vld [vmem:[%s6395_s14 + $0xd0] sm:$0xff]  ;;  %v4291_v34 = vpack.c.bf16 %v2660_v25, %v2659_v24 }
 0xd31   : > { %v4323_v35 = vpack.c.bf16 %v2692_v29, %v2691_v28  ;;  %v2716_v28 = vld [vmem:[%s6395_s14 + $0x208] sm:$0xff] }
 0xd33   : > { %4256 = vmatpush1.bf16.msra.mxu0 %v4255_v38  ;;  %4272 = vmatpush1.bf16.msra.mxu1 %v4271_v39  ;;  %v2662_v38 = vld [vmem:[%s6395_s14 + $0x58] sm:$0xff]  ;;  %v4293_v39 = vpack.c.bf16 %v2678_v11, %v2677_v30 }
 0xd34   : > { %4274 = vmatprep.subr.bf16.mxu0 %v4273_v42  ;;  %4306 = vmatprep.subr.bf16.mxu1 %v4305_v43  ;;  %v2694_v42 = vld [vmem:[%s6395_s14 + $0x158] sm:$0xff]  ;;  %v2679_v43 = vld [vmem:[%s6395_s14 + $0xe0] sm:$0xff]  ;;  %v4295_v47 = vpack.c.bf16 %v2662_v38, %v2661_v37 }
 0xd35   : > { %v4327_v48 = vpack.c.bf16 %v2694_v42, %v2693_v41  ;;  %v2766_v41 = vld [vmem:[%s6395_s14 + $0x398] sm:$0xff] }
 0xd36   : > { %3628 = vmatmul.mubr.msk.f32.vlgmr.msra.gmra.mrb[18].mxu0 %vm605_vm1, %v5188_v33  ;;  %3629 = vmatmul.mubr.msk.f32.vlgmr.msra.gmra.mrb[24].mxu1 %vm605_vm1, %v5188_v33 }
 0xd37   : > { %4276 = vmatpush3.bf16.msra.mxu0 %v4275_v50  ;;  %4308 = vmatpush3.bf16.msra.mxu1 %v4307_v36  ;;  %v4297_v50 = vpack.c.bf16 %v2680_v44, %v2679_v43  ;;  %v4329_v36 = vpack.c.bf16 %v2712_v46, %v2711_v45  ;;  %v2717_v46 = vld [vmem:[%s6395_s14 + $0x210] sm:$0xff] }
 0xd38   : > { %4278 = vmatprep.subr.bf16.mxu0 %v4277_v53  ;;  %4310 = vmatprep.subr.bf16.mxu1 %v4309_v54  ;;  %v2696_v53 = vld [vmem:[%s6395_s14 + $0x168] sm:$0xff]  ;;  %v4299_v54 = vpack.c.bf16 %v2664_v51, %v2663_v49  ;;  %v2749_v51 = vld [vmem:[%s6395_s14 + $0x310] sm:$0xff] }
 0xd39   : > { %v4331_v55 = vpack.c.bf16 %v2696_v53, %v2695_v52  ;;  %v2750_v52 = vld [vmem:[%s6395_s14 + $0x318] sm:$0xff]  ;;  %v2735_v53 = vld [vmem:[%s6395_s14 + $0x2a0] sm:$0xff] }
 0xd3a   : > { %v4375_v57 = vpack.c.bf16 %v2750_v52, %v2749_v51 }
 0xd3b   : > { %4280 = vmatpush3.bf16.msra.mxu0 %v4279_v61  ;;  %4312 = vmatpush3.bf16.msra.mxu1 %v4311_v62  ;;  %v2665_v61 = vld [vmem:[%s6395_s14 + $0x70] sm:$0xff]  ;;  %v2666_v62 = vld [vmem:[%s6395_s14 + $0x78] sm:$0xff] }
 0xd3c   : > { %4282 = vmatprep.subr.bf16.mxu0 %v4281_v59  ;;  %4314 = vmatprep.subr.bf16.mxu1 %v4313_v1  ;;  %v4303_v0 = vpack.c.bf16 %v2666_v62, %v2665_v61  ;;  %v2697_v59 = vld [vmem:[%s6395_s14 + $0x170] sm:$0xff]  ;;  %v2698_v1 = vld [vmem:[%s6395_s14 + $0x178] sm:$0xff] }
 0xd3d   : > { %v4335_v2 = vpack.c.bf16 %v2698_v1, %v2697_v59  ;;  %v2737_v59 = vld [vmem:[%s6395_s14 + $0x2b0] sm:$0xff] }
 0xd3f   : > { %4284 = vmatpush3.bf16.msra.mxu0 %v4283_v9  ;;  %4316 = vmatpush3.bf16.msra.mxu1 %v4315_v10  ;;  %v4369_v9 = vpack.c.bf16 %v2764_v8, %v2763_v6  ;;  %v1984_v10 = vlaneseq  ;;  %v2770_v6 = vld [vmem:[%s6395_s14 + $0x3b8] sm:$0xff] }
 0xd40   : > { %4286 = vmatprep.subr.bf16.mxu0 %v4285_v14  ;;  %4318 = vmatprep.subr.bf16.mxu1 %v4317_v15  ;;  %v5668_v14 = vld [vmem:[%s6394_s13 + $0x8] sm:$0xff] }
 0xd41   : > { %v5662_v12 = vshrl.u32 %v1984_v10, 7  ;;  %v2722_v10 = vld [vmem:[%s6395_s14 + $0x238] sm:$0xff] }
 0xd43   : > { %4288 = vmatpush3.bf16.msra.mxu0 %v4287_v27  ;;  %4320 = vmatpush3.bf16.msra.mxu1 %v4319_v23  ;;  %v2010_v13 = vsub.s32 6, %v5662_v12  ;;  %v1986_v16 = vsub.s32 0, %v5662_v12  ;;  %v1994_v17 = vsub.s32 2, %v5662_v12  ;;  %v1990_v20 = vsub.s32 1, %v5662_v12 }
 0xd44   : > { %4290 = vmatprep.subr.bf16.mxu0 %v4289_v19  ;;  %4322 = vmatprep.subr.bf16.mxu1 %v4321_v26  ;;  %v1998_v21 = vsub.s32 3, %v5662_v12  ;;  %v2715_v26 = vld [vmem:[%s6395_s14 + $0x200] sm:$0xff]  ;;  %v2006_v1 = vsub.s32 5, %v5662_v12 }
 0xd45   : > { %v5673_v15 = vrot.slane %v5668_v14, %v2010_v13  ;;  %v1987_v22 = vrot.slane %v5680_v18, %v1986_v16  ;;  %v1995_v27 = vrot.slane %v5680_v18, %v1994_v17  ;;  %v1991_v23 = vrot.slane %v5680_v18, %v1990_v20 }
 0xd46   : > { %v1999_v24 = vrot.slane %v5680_v18, %v1998_v21  ;;  %v4339_v44 = vpack.c.bf16 %v2716_v28, %v2715_v26  ;;  %v2740_v28 = vld [vmem:[%s6395_s14 + $0x2c8] sm:$0xff] }
 0xd47   : > { %4292 = vmatpush3.bf16.msra.mxu0 %v4291_v34  ;;  %4324 = vmatpush3.bf16.msra.mxu1 %v4323_v35  ;;  %v2748_v34 = vld [vmem:[%s6395_s14 + $0x308] sm:$0xff]  ;;  %v2733_v35 = vld [vmem:[%s6395_s14 + $0x290] sm:$0xff] }
 0xd48   : > { %4294 = vmatprep.subr.bf16.mxu0 %v4293_v39  ;;  %4326 = vmatprep.subr.bf16.mxu1 %v4325_v40  ;;  %v2734_v39 = vld [vmem:[%s6395_s14 + $0x298] sm:$0xff]  ;;  %v2765_v40 = vld [vmem:[%s6395_s14 + $0x390] sm:$0xff]  ;;  %v4371_v45 = vpack.c.bf16 %v2748_v34, %v2747_v32 }
 0xd4b   : > { %4296 = vmatpush3.bf16.msra.mxu0 %v4295_v47  ;;  %4328 = vmatpush3.bf16.msra.mxu1 %v4327_v48  ;;  %v2718_v47 = vld [vmem:[%s6395_s14 + $0x218] sm:$0xff] }
 0xd4c   : > { %4298 = vmatprep.subr.bf16.mxu0 %v4297_v50  ;;  %4330 = vmatprep.subr.bf16.mxu1 %v4329_v36  ;;  %v4341_v50 = vpack.c.bf16 %v2734_v39, %v2733_v35  ;;  %v4373_v36 = vpack.c.bf16 %v2766_v41, %v2765_v40  ;;  %v4343_v56 = vpack.c.bf16 %v2718_v47, %v2717_v46  ;;  %v2723_v35 = vld [vmem:[%s6395_s14 + $0x240] sm:$0xff]  ;;  %v2742_v47 = vld [vmem:[%s6395_s14 + $0x2d8] sm:$0xff] }
 0xd4f   : > { %4300 = vmatpush3.bf16.msra.mxu0 %v4299_v54  ;;  %4332 = vmatpush3.bf16.msra.mxu1 %v4331_v55  ;;  %v2736_v54 = vld [vmem:[%s6395_s14 + $0x2a8] sm:$0xff]  ;;  %v2767_v55 = vld [vmem:[%s6395_s14 + $0x3a0] sm:$0xff] }
 0xd50   : > { %4302 = vmatprep.subr.bf16.mxu0 %v4301_v58  ;;  %4334 = vmatprep.subr.bf16.mxu1 %v4333_v63  ;;  %v2719_v58 = vld [vmem:[%s6395_s14 + $0x220] sm:$0xff]  ;;  %v4345_v61 = vpack.c.bf16 %v2736_v54, %v2735_v53  ;;  %v4377_v62 = vpack.c.bf16 %v2768_v3, %v2767_v55  ;;  %v2725_v53 = vld [vmem:[%s6395_s14 + $0x250] sm:$0xff]  ;;  %v2726_v54 = vld [vmem:[%s6395_s14 + $0x258] sm:$0xff] }
 0xd51   : > { %v2751_v63 = vld [vmem:[%s6395_s14 + $0x320] sm:$0xff] }
 0xd53   : > { %4304 = vmatpush3.bf16.msra.mxu0 %v4303_v0  ;;  %4336 = vmatpush3.bf16.msra.mxu1 %v4335_v2  ;;  %v2752_v0 = vld [vmem:[%s6395_s14 + $0x328] sm:$0xff]  ;;  %v2014_v2 = vsub.s32 7, %v5662_v12 }
 0xd54   : > { %4338 = vmatprep.subr.bf16.mxu0 %v4337_v7  ;;  %4370 = vmatprep.subr.bf16.mxu1 %v4369_v9  ;;  %v4347_v7 = vpack.c.bf16 %v2720_v60, %v2719_v58  ;;  %v4379_v8 = vpack.c.bf16 %v2752_v0, %v2751_v63  ;;  %v2721_v9 = vld [vmem:[%s6395_s14 + $0x230] sm:$0xff]  ;;  %v2743_v58 = vld [vmem:[%s6395_s14 + $0x2e0] sm:$0xff]  ;;  %v2744_v60 = vld [vmem:[%s6395_s14 + $0x2e8] sm:$0xff]  ;;  %v2002_v63 = vsub.s32 4, %v5662_v12  ;;  %v4359_v0 = vpack.c.bf16 %v2726_v54, %v2725_v53 }
 0xd55   : > { %v2015_v26 = vrot.slane %v5680_v18, %v2014_v2  ;;  %v4351_v32 = vpack.c.bf16 %v2722_v10, %v2721_v9  ;;  %v2760_v9 = vld [vmem:[%s6395_s14 + $0x368] sm:$0xff]  ;;  %v2745_v10 = vld [vmem:[%s6395_s14 + $0x2f0] sm:$0xff]  ;;  %v2875_v12 = vld [vmem:[%s6395_s14 + $0x700] sm:$0xff] }
 0xd56   : > { %v2797_v53 = vld [vmem:[%s6395_s14 + $0x490] sm:$0xff] }
 0xdd9   : > { %v2133_v25 = vpop.f32.mrb[12].mxu0  ;;  %v2204_v19 = vpop.f32.mrb[18].mxu1 }
 0xdda   : > { %v2134_v29 = vadd.f32 %v2133_v25, %v1987_v22  ;;  %v2205_v30 = vadd.f32 %v2204_v19, %v1995_v27  ;;  %v2135_v11 = vpop.f32.mrb[13].mxu0  ;;  %v2206_v31 = vpop.f32.mrb[19].mxu1  ;;  %v4349_v22 = vpack.c.bf16 %v2738_v4, %v2737_v59  ;;  %v4381_v27 = vpack.c.bf16 %v2770_v6, %v2769_v5  ;;  %v2739_v25 = vld [vmem:[%s6395_s14 + $0x2c0] sm:$0xff]  ;;  %v2728_v5 = vld [vmem:[%s6395_s14 + $0x268] sm:$0xff] }
 0xddb   : > { %v2136_v37 = vadd.f32 %v2135_v11, %v1991_v23  ;;  %v2207_v38 = vadd.f32 %v2206_v31, %v1999_v24  ;;  %v2753_v23 = vld [vmem:[%s6395_s14 + $0x330] sm:$0xff]  ;;  %v2754_v24 = vld [vmem:[%s6395_s14 + $0x338] sm:$0xff]  ;;  %v2007_v19 = vrot.slane %v5680_v18, %v2006_v1  ;;  %v4353_v40 = vpack.c.bf16 %v2740_v28, %v2739_v25  ;;  %v2727_v4 = vld [vmem:[%s6395_s14 + $0x260] sm:$0xff] }
 0xddc   : > { %v2635_v48 = vmax.f32 %v2134_v29, 0.0  ;;  %v2637_v49 = vmax.f32 %v2205_v30, 0.0  ;;  %v2771_v29 = vld [vmem:[%s6395_s14 + $0x3c0] sm:$0xff]  ;;  %v2772_v30 = vld [vmem:[%s6395_s14 + $0x3c8] sm:$0xff]  ;;  %v4383_v34 = vpack.c.bf16 %v2754_v24, %v2753_v23  ;;  %v4361_v6 = vpack.c.bf16 %v2744_v60, %v2743_v58  ;;  %v2778_v23 = vld [vmem:[%s6395_s14 + $0x3f8] sm:$0xff] }
 0xddd   : > { %v2636_v42 = vmax.f32 %v2136_v37, 0.0  ;;  %v2638_v43 = vmax.f32 %v2207_v38, 0.0  ;;  %v2724_v37 = vld [vmem:[%s6395_s14 + $0x248] sm:$0xff]  ;;  %v4385_v41 = vpack.c.bf16 %v2772_v30, %v2771_v29  ;;  %v2003_v24 = vrot.slane %v5680_v18, %v2002_v63 }
 0xdde   : > { %v4355_v51 = vpack.c.bf16 %v2724_v37, %v2723_v35  ;;  %v2011_v25 = vrot.slane %v5680_v18, %v2010_v13  ;;  %v2019_v28 = vrot.slane %v5668_v14, %v1986_v16  ;;  %v4363_v29 = vpack.c.bf16 %v2728_v5, %v2727_v4  ;;  %v2761_v13 = vld [vmem:[%s6395_s14 + $0x370] sm:$0xff]  ;;  %v2762_v18 = vld [vmem:[%s6395_s14 + $0x378] sm:$0xff]  ;;  %v2796_v37 = vld [vmem:[%s6395_s14 + $0x488] sm:$0xff] }
 0xddf   : > { %2978 = vmatprep.mubr.f32.mxu0 %v2636_v42  ;;  %3048 = vmatprep.mubr.f32.mxu1 %v2638_v43  ;;  %v2755_v42 = vld [vmem:[%s6395_s14 + $0x340] sm:$0xff]  ;;  %v2756_v43 = vld [vmem:[%s6395_s14 + $0x348] sm:$0xff]  ;;  %v2027_v16 = vrot.slane %v5668_v14, %v1994_v17  ;;  %v2031_v17 = vrot.slane %v5668_v14, %v1998_v21 }
 0xde0   : > { %2979 = vmatmul.mubr.f32.vlgmr.msra.gmra.mrb[20].mxu0 %v2635_v48  ;;  %3049 = vmatmul.mubr.f32.vlgmr.msra.gmra.mrb[26].mxu1 %v2637_v49  ;;  %v2773_v48 = vld [vmem:[%s6395_s14 + $0x3d0] sm:$0xff]  ;;  %v2774_v49 = vld [vmem:[%s6395_s14 + $0x3d8] sm:$0xff]  ;;  %v4387_v52 = vpack.c.bf16 %v2756_v43, %v2755_v42  ;;  %v4399_v42 = vpack.c.bf16 %v2762_v18, %v2761_v13  ;;  %v2779_v21 = vld [vmem:[%s6395_s14 + $0x400] sm:$0xff] }
 0xde1   : > { %4340 = vmatpush3.bf16.msra.mxu0 %v4339_v44  ;;  %4372 = vmatpush3.bf16.msra.mxu1 %v4371_v45  ;;  %v2741_v44 = vld [vmem:[%s6395_s14 + $0x2d0] sm:$0xff]  ;;  %v4389_v3 = vpack.c.bf16 %v2774_v49, %v2773_v48  ;;  %v2802_v18 = vld [vmem:[%s6395_s14 + $0x4b8] sm:$0xff] }
 0xde2   : > { %4342 = vmatprep.subr.bf16.mxu0 %v4341_v50  ;;  %4374 = vmatprep.subr.bf16.mxu1 %v4373_v36  ;;  %v4357_v55 = vpack.c.bf16 %v2742_v47, %v2741_v44  ;;  %v2801_v13 = vld [vmem:[%s6395_s14 + $0x4b0] sm:$0xff] }
 0xde5   : > { %4344 = vmatpush3.bf16.msra.mxu0 %v4343_v56  ;;  %4376 = vmatpush3.bf16.msra.mxu1 %v4375_v57  ;;  %v2757_v56 = vld [vmem:[%s6395_s14 + $0x350] sm:$0xff]  ;;  %v2758_v57 = vld [vmem:[%s6395_s14 + $0x358] sm:$0xff] }
 0xde6   : > { %4346 = vmatprep.subr.bf16.mxu0 %v4345_v61  ;;  %4378 = vmatprep.subr.bf16.mxu1 %v4377_v62  ;;  %v2775_v61 = vld [vmem:[%s6395_s14 + $0x3e0] sm:$0xff]  ;;  %v2776_v62 = vld [vmem:[%s6395_s14 + $0x3e8] sm:$0xff]  ;;  %v4391_v59 = vpack.c.bf16 %v2758_v57, %v2757_v56  ;;  %v2830_v56 = vld [vmem:[%s6395_s14 + $0x598] sm:$0xff] }
 0xde9   : > { %v5800_v11 = vpop.f32.mrb[14].mxu0  ;;  %v5802_v31 = vpop.f32.mrb[20].mxu1  ;;  %4348 = vmatpush3.bf16.msra.mxu0 %v4347_v7  ;;  %4380 = vmatpush3.bf16.msra.mxu1 %v4379_v8  ;;  %v4393_v7 = vpack.c.bf16 %v2776_v62, %v2775_v61  ;;  %v2759_v8 = vld [vmem:[%s6395_s14 + $0x360] sm:$0xff]  ;;  %v2781_v62 = vld [vmem:[%s6395_s14 + $0x410] sm:$0xff] }
 0xdea   : > { %v2277_v38 = vpop.f32.mrb[15].mxu0  ;;  %v2348_v39 = vpop.f32.mrb[21].mxu1  ;;  %4350 = vmatprep.subr.bf16.mxu0 %v4349_v22  ;;  %4382 = vmatprep.subr.bf16.mxu1 %v4381_v27  ;;  %v2746_v22 = vld [vmem:[%s6395_s14 + $0x2f8] sm:$0xff]  ;;  %v2777_v27 = vld [vmem:[%s6395_s14 + $0x3f0] sm:$0xff]  ;;  %v4395_v30 = vpack.c.bf16 %v2760_v9, %v2759_v8  ;;  %v2276_v43 = vadd.f32 %v5800_v11, %v2003_v24  ;;  %v2347_v48 = vadd.f32 %v5802_v31, %v2011_v25  ;;  %v2780_v11 = vld [vmem:[%s6395_s14 + $0x408] sm:$0xff] }
 0xdeb   : > { %v2278_v45 = vadd.f32 %v2277_v38, %v2007_v19  ;;  %v2349_v46 = vadd.f32 %v2348_v39, %v2015_v26  ;;  %v2729_v19 = vld [vmem:[%s6395_s14 + $0x270] sm:$0xff]  ;;  %v2730_v26 = vld [vmem:[%s6395_s14 + $0x278] sm:$0xff]  ;;  %v4397_v35 = vpack.c.bf16 %v2778_v23, %v2777_v27  ;;  %v2827_v38 = vld [vmem:[%s6395_s14 + $0x580] sm:$0xff]  ;;  %v4403_v57 = vpack.c.bf16 %v2780_v11, %v2779_v21 }
 0xdec   : > { %v2828_v39 = vld [vmem:[%s6395_s14 + $0x588] sm:$0xff]  ;;  %v2811_v31 = vld [vmem:[%s6395_s14 + $0x500] sm:$0xff]  ;;  %v2639_v58 = vmax.f32 %v2276_v43, 0.0  ;;  %v2641_v60 = vmax.f32 %v2347_v48, 0.0 }
 0xded   : > { %v2640_v50 = vmax.f32 %v2278_v45, 0.0  ;;  %v2642_v36 = vmax.f32 %v2349_v46, 0.0  ;;  %4352 = vmatpush3.bf16.msra.mxu0 %v4351_v32  ;;  %4384 = vmatpush3.bf16.msra.mxu1 %v4383_v34  ;;  %v2795_v32 = vld [vmem:[%s6395_s14 + $0x480] sm:$0xff]  ;;  %v4365_v34 = vpack.c.bf16 %v2746_v22, %v2745_v10  ;;  %v4433_v47 = vpack.c.bf16 %v2828_v39, %v2827_v38  ;;  %v2800_v9 = vld [vmem:[%s6395_s14 + $0x4a8] sm:$0xff] }
 0xdee   : > { %4354 = vmatprep.subr.bf16.mxu0 %v4353_v40  ;;  %4386 = vmatprep.subr.bf16.mxu1 %v4385_v41  ;;  %v2023_v40 = vrot.slane %v5668_v14, %v1990_v20  ;;  %v4367_v41 = vpack.c.bf16 %v2730_v26, %v2729_v19  ;;  %v4401_v46 = vpack.c.bf16 %v2796_v37, %v2795_v32  ;;  %v2799_v8 = vld [vmem:[%s6395_s14 + $0x4a0] sm:$0xff]  ;;  %v2832_v27 = vld [vmem:[%s6395_s14 + $0x5a8] sm:$0xff]  ;;  %v2833_v32 = vld [vmem:[%s6395_s14 + $0x5b0] sm:$0xff] }
 0xdef   : > { %3118 = vmatprep.mubr.f32.mxu0 %v2640_v50  ;;  %3188 = vmatprep.mubr.f32.mxu1 %v2642_v36  ;;  %v2831_v22 = vld [vmem:[%s6395_s14 + $0x5a0] sm:$0xff]  ;;  %v4409_v25 = vpack.c.bf16 %v2800_v9, %v2799_v8  ;;  %v2784_v26 = vld [vmem:[%s6395_s14 + $0x428] sm:$0xff]  ;;  %v2035_v37 = vrot.slane %v5668_v14, %v2002_v63  ;;  %v4413_v39 = vpack.c.bf16 %v2802_v18, %v2801_v13  ;;  %v2841_v13 = vld [vmem:[%s6395_s14 + $0x5f0] sm:$0xff] }
 0xdf0   : > { %v2783_v19 = vld [vmem:[%s6395_s14 + $0x420] sm:$0xff]  ;;  %v2804_v43 = vld [vmem:[%s6395_s14 + $0x4c8] sm:$0xff]  ;;  %v2842_v18 = vld [vmem:[%s6395_s14 + $0x5f8] sm:$0xff] }
 0xdf1   : > { %4356 = vmatpush3.bf16.msra.mxu0 %v4355_v51  ;;  %4388 = vmatpush3.bf16.msra.mxu1 %v4387_v52  ;;  %v2812_v52 = vld [vmem:[%s6395_s14 + $0x508] sm:$0xff]  ;;  %v2803_v63 = vld [vmem:[%s6395_s14 + $0x4c0] sm:$0xff] }
 0xdf2   : > { %4358 = vmatprep.subr.bf16.mxu0 %v4357_v55  ;;  %4390 = vmatprep.subr.bf16.mxu1 %v4389_v3  ;;  %v2798_v55 = vld [vmem:[%s6395_s14 + $0x498] sm:$0xff]  ;;  %v2829_v3 = vld [vmem:[%s6395_s14 + $0x590] sm:$0xff]  ;;  %v4435_v61 = vpack.c.bf16 %v2812_v52, %v2811_v31  ;;  %v4417_v31 = vpack.c.bf16 %v2804_v43, %v2803_v63  ;;  %v2787_v52 = vld [vmem:[%s6395_s14 + $0x440] sm:$0xff] }
 0xdf3   : > { %v4405_v5 = vpack.c.bf16 %v2798_v55, %v2797_v53  ;;  %v2788_v53 = vld [vmem:[%s6395_s14 + $0x448] sm:$0xff]  ;;  %v2839_v9 = vld [vmem:[%s6395_s14 + $0x5e0] sm:$0xff] }
 0xdf4   : > { %v2820_v55 = vld [vmem:[%s6395_s14 + $0x548] sm:$0xff]  ;;  %v2891_v63 = vld [vmem:[%s6395_s14 + $0x780] sm:$0xff] }
 0xdf5   : > { %4360 = vmatpush3.bf16.msra.mxu0 %v4359_v0  ;;  %4392 = vmatpush3.bf16.msra.mxu1 %v4391_v59  ;;  %v2782_v0 = vld [vmem:[%s6395_s14 + $0x418] sm:$0xff]  ;;  %v2813_v59 = vld [vmem:[%s6395_s14 + $0x510] sm:$0xff]  ;;  %v2808_v8 = vld [vmem:[%s6395_s14 + $0x4e8] sm:$0xff] }
 0xdf6   : > { %4362 = vmatprep.subr.bf16.mxu0 %v4361_v6  ;;  %4394 = vmatprep.subr.bf16.mxu1 %v4393_v7  ;;  %v4437_v6 = vpack.c.bf16 %v2830_v56, %v2829_v3  ;;  %v2814_v7 = vld [vmem:[%s6395_s14 + $0x518] sm:$0xff]  ;;  %v4407_v23 = vpack.c.bf16 %v2782_v0, %v2781_v62  ;;  %v2805_v3 = vld [vmem:[%s6395_s14 + $0x4d0] sm:$0xff]  ;;  %v2892_v43 = vld [vmem:[%s6395_s14 + $0x788] sm:$0xff] }
 0xdf7   : > { %v4439_v24 = vpack.c.bf16 %v2814_v7, %v2813_v59  ;;  %v2806_v56 = vld [vmem:[%s6395_s14 + $0x4d8] sm:$0xff]  ;;  %v2789_v0 = vld [vmem:[%s6395_s14 + $0x450] sm:$0xff]  ;;  %v2807_v7 = vld [vmem:[%s6395_s14 + $0x4e0] sm:$0xff] }
 0xdf8   : > { %v4421_v62 = vpack.c.bf16 %v2806_v56, %v2805_v3  ;;  %v2790_v59 = vld [vmem:[%s6395_s14 + $0x458] sm:$0xff]  ;;  %v2845_v56 = vld [vmem:[%s6395_s14 + $0x610] sm:$0xff] }
 0xdf9   : > { %v2417_v44 = vpop.f32.mrb[16].mxu0  ;;  %v2488_v45 = vpop.f32.mrb[22].mxu1  ;;  %4364 = vmatpush3.bf16.msra.mxu0 %v4363_v29  ;;  %4396 = vmatpush3.bf16.msra.mxu1 %v4395_v30  ;;  %v4441_v29 = vpack.c.bf16 %v2832_v27, %v2831_v22  ;;  %v2816_v30 = vld [vmem:[%s6395_s14 + $0x528] sm:$0xff]  ;;  %v4423_v22 = vpack.c.bf16 %v2790_v59, %v2789_v0 }
 0xdfa   : > { %v5921_v49 = vadd.f32 %v2417_v44, %v2019_v28  ;;  %v5923_v50 = vadd.f32 %v2488_v45, %v2027_v16  ;;  %v2419_v20 = vpop.f32.mrb[17].mxu0  ;;  %v2490_v36 = vpop.f32.mrb[23].mxu1  ;;  %4366 = vmatprep.subr.bf16.mxu0 %v4365_v34  ;;  %4398 = vmatprep.subr.bf16.mxu1 %v4397_v35  ;;  %v2815_v28 = vld [vmem:[%s6395_s14 + $0x520] sm:$0xff]  ;;  %v2834_v16 = vld [vmem:[%s6395_s14 + $0x5b8] sm:$0xff]  ;;  %v4411_v34 = vpack.c.bf16 %v2784_v26, %v2783_v19  ;;  %v2785_v35 = vld [vmem:[%s6395_s14 + $0x430] sm:$0xff] }
 0xdfb   : > { %v2420_v51 = vadd.f32 %v2419_v20, %v2023_v40  ;;  %v2491_v54 = vadd.f32 %v2490_v36, %v2031_v17  ;;  %v4443_v38 = vpack.c.bf16 %v2816_v30, %v2815_v28  ;;  %v2786_v40 = vld [vmem:[%s6395_s14 + $0x438] sm:$0xff]  ;;  %v2817_v17 = vld [vmem:[%s6395_s14 + $0x530] sm:$0xff]  ;;  %v2835_v44 = vld [vmem:[%s6395_s14 + $0x5c0] sm:$0xff] }
 0xdfc   : > { %v2836_v45 = vld [vmem:[%s6395_s14 + $0x5c8] sm:$0xff]  ;;  %v4415_v48 = vpack.c.bf16 %v2786_v40, %v2785_v35  ;;  %v2823_v19 = vld [vmem:[%s6395_s14 + $0x560] sm:$0xff]  ;;  %v2810_v30 = vld [vmem:[%s6395_s14 + $0x4f8] sm:$0xff] }
 0xdfd   : > { %4368 = vmatpush3.bf16.msra.mxu0 %v4367_v41  ;;  %4400 = vmatpush3.bf16.msra.mxu1 %v4399_v42  ;;  %v2644_v4 = vmax.f32 %v2420_v51, 0.0  ;;  %v2646_v10 = vmax.f32 %v2491_v54, 0.0  ;;  %v2818_v41 = vld [vmem:[%s6395_s14 + $0x538] sm:$0xff]  ;;  %v4445_v42 = vpack.c.bf16 %v2834_v16, %v2833_v32  ;;  %v4449_v54 = vpack.c.bf16 %v2836_v45, %v2835_v44  ;;  %v2824_v28 = vld [vmem:[%s6395_s14 + $0x568] sm:$0xff]  ;;  %v2793_v35 = vld [vmem:[%s6395_s14 + $0x470] sm:$0xff] }
 0xdfe   : > { %4402 = vmatprep.subr.bf16.mxu0 %v4401_v46  ;;  %4434 = vmatprep.subr.bf16.mxu1 %v4433_v47  ;;  %v4447_v20 = vpack.c.bf16 %v2818_v41, %v2817_v17  ;;  %v4459_v16 = vpack.c.bf16 %v2824_v28, %v2823_v19  ;;  %v2826_v40 = vld [vmem:[%s6395_s14 + $0x578] sm:$0xff]  ;;  %v2859_v17 = vld [vmem:[%s6395_s14 + $0x680] sm:$0xff]  ;;  %v2860_v41 = vld [vmem:[%s6395_s14 + $0x688] sm:$0xff]  ;;  %v2047_v44 = vrot.slane %v5668_v14, %v2014_v2 }
 0xdff   : > { %v2897_v19 = vld [vmem:[%s6395_s14 + $0x7b0] sm:$0xff] }
 0xe00   : > { %3119 = vmatmul.mubr.f32.vlgmr.msra.gmra.mrb[22].mxu0 %v2639_v58  ;;  %3189 = vmatmul.mubr.f32.vlgmr.msra.gmra.mrb[28].mxu1 %v2641_v60  ;;  %v2838_v58 = vld [vmem:[%s6395_s14 + $0x5d8] sm:$0xff]  ;;  %v4419_v60 = vpack.c.bf16 %v2788_v53, %v2787_v52 }
 0xe01   : > { %4404 = vmatpush3.bf16.msra.mxu0 %v4403_v57  ;;  %3258 = vmatprep.mubr.f32.mxu0 %v2644_v4  ;;  %v2837_v57 = vld [vmem:[%s6395_s14 + $0x5d0] sm:$0xff]  ;;  %v2862_v52 = vld [vmem:[%s6395_s14 + $0x698] sm:$0xff] }
 0xe02   : > { %4436 = vmatpush3.bf16.msra.mxu1 %v4435_v61  ;;  %3328 = vmatprep.mubr.f32.mxu1 %v2646_v10  ;;  %v2821_v4 = vld [vmem:[%s6395_s14 + $0x550] sm:$0xff]  ;;  %v2840_v10 = vld [vmem:[%s6395_s14 + $0x5e8] sm:$0xff] }
 0xe03   : > { %4406 = vmatprep.subr.bf16.mxu0 %v4405_v5  ;;  %4438 = vmatprep.subr.bf16.mxu1 %v4437_v6  ;;  %v4453_v5 = vpack.c.bf16 %v2838_v58, %v2837_v57  ;;  %v2822_v6 = vld [vmem:[%s6395_s14 + $0x558] sm:$0xff]  ;;  %v4457_v26 = vpack.c.bf16 %v2840_v10, %v2839_v9  ;;  %v2877_v57 = vld [vmem:[%s6395_s14 + $0x710] sm:$0xff]  ;;  %v2645_v58 = vmax.f32 %v5923_v50, 0.0  ;;  %v2895_v50 = vld [vmem:[%s6395_s14 + $0x7a0] sm:$0xff] }
 0xe04   : > { %v4455_v27 = vpack.c.bf16 %v2822_v6, %v2821_v4  ;;  %v2896_v4 = vld [vmem:[%s6395_s14 + $0x7a8] sm:$0xff]  ;;  %v2847_v9 = vld [vmem:[%s6395_s14 + $0x620] sm:$0xff] }
 0xe05   : > { %4408 = vmatpush3.bf16.msra.mxu0 %v4407_v23  ;;  %v4425_v23 = vpack.c.bf16 %v2808_v8, %v2807_v7  ;;  %v2848_v10 = vld [vmem:[%s6395_s14 + $0x628] sm:$0xff] }
 0xe06   : > { %4440 = vmatpush3.bf16.msra.mxu1 %v4439_v24  ;;  %4410 = vmatprep.subr.bf16.mxu0 %v4409_v25  ;;  %v2791_v24 = vld [vmem:[%s6395_s14 + $0x460] sm:$0xff]  ;;  %v2792_v25 = vld [vmem:[%s6395_s14 + $0x468] sm:$0xff]  ;;  %v4475_v28 = vpack.c.bf16 %v2848_v10, %v2847_v9  ;;  %v2858_v9 = vld [vmem:[%s6395_s14 + $0x678] sm:$0xff] }
 0xe07   : > { %4442 = vmatprep.subr.bf16.mxu1 %v4441_v29  ;;  %v2809_v29 = vld [vmem:[%s6395_s14 + $0x4f0] sm:$0xff]  ;;  %v4427_v32 = vpack.c.bf16 %v2792_v25, %v2791_v24  ;;  %v2866_v25 = vld [vmem:[%s6395_s14 + $0x6b8] sm:$0xff] }
 0xe08   : > { %v2865_v24 = vld [vmem:[%s6395_s14 + $0x6b0] sm:$0xff] }
 0xe09   : > { %v2559_v46 = vpop.f32.mrb[18].mxu0  ;;  %v2630_v47 = vpop.f32.mrb[24].mxu1  ;;  %4412 = vmatpush3.bf16.msra.mxu0 %v4411_v34  ;;  %v4429_v34 = vpack.c.bf16 %v2810_v30, %v2809_v29  ;;  %v4477_v30 = vpack.c.bf16 %v2866_v25, %v2865_v24 }
 0xe0a   : > { %v6024_v36 = vadd.f32 %v2559_v46, %v2035_v37  ;;  %v6027_v21 = vadd.f32 %v2630_v47, %v5673_v15  ;;  %4444 = vmatpush3.bf16.msra.mxu1 %v4443_v38  ;;  %v6029_v11 = vpop.f32.mrb[19].mxu0  ;;  %v6031_v51 = vpop.f32.mrb[25].mxu1  ;;  %4414 = vmatprep.subr.bf16.mxu0 %v4413_v39  ;;  %v2819_v15 = vld [vmem:[%s6395_s14 + $0x540] sm:$0xff]  ;;  %v2794_v37 = vld [vmem:[%s6395_s14 + $0x478] sm:$0xff]  ;;  %v2825_v38 = vld [vmem:[%s6395_s14 + $0x570] sm:$0xff]  ;;  %v4461_v39 = vpack.c.bf16 %v2842_v18, %v2841_v13 }
 0xe0b   : > { %4446 = vmatprep.subr.bf16.mxu1 %v4445_v42  ;;  %v4451_v61 = vpack.c.bf16 %v2820_v55, %v2819_v15  ;;  %v2039_v42 = vrot.slane %v5668_v14, %v2006_v1  ;;  %v4431_v45 = vpack.c.bf16 %v2794_v37, %v2793_v35  ;;  %v4463_v46 = vpack.c.bf16 %v2826_v40, %v2825_v38  ;;  %v2843_v1 = vld [vmem:[%s6395_s14 + $0x600] sm:$0xff]  ;;  %v2876_v14 = vld [vmem:[%s6395_s14 + $0x708] sm:$0xff]  ;;  %v2849_v13 = vld [vmem:[%s6395_s14 + $0x630] sm:$0xff] }
 0xe0c   : > { %v4465_v47 = vpack.c.bf16 %v2860_v41, %v2859_v17  ;;  %v2633_v53 = vadd.f32 %v6031_v51, %v2047_v44  ;;  %v2643_v55 = vmax.f32 %v5921_v49, 0.0  ;;  %v4499_v3 = vpack.c.bf16 %v2876_v14, %v2875_v12  ;;  %v2846_v51 = vld [vmem:[%s6395_s14 + $0x618] sm:$0xff]  ;;  %v2867_v35 = vld [vmem:[%s6395_s14 + $0x6c0] sm:$0xff]  ;;  %v2868_v37 = vld [vmem:[%s6395_s14 + $0x6c8] sm:$0xff] }
 0xe0d   : > { %4416 = vmatpush3.bf16.msra.mxu0 %v4415_v48  ;;  %v2844_v48 = vld [vmem:[%s6395_s14 + $0x608] sm:$0xff]  ;;  %v2562_v2 = vadd.f32 %v6029_v11, %v2039_v42  ;;  %v2894_v11 = vld [vmem:[%s6395_s14 + $0x798] sm:$0xff]  ;;  %v4471_v6 = vpack.c.bf16 %v2846_v51, %v2845_v56  ;;  %v2899_v38 = vld [vmem:[%s6395_s14 + $0x7c0] sm:$0xff]  ;;  %v4481_v41 = vpack.c.bf16 %v2868_v37, %v2867_v35  ;;  %v2647_v25 = vmax.f32 %v6024_v36, 0.0 }
 0xe0e   : > { %4448 = vmatpush3.bf16.msra.mxu1 %v4447_v20  ;;  %4418 = vmatprep.subr.bf16.mxu0 %v4417_v31  ;;  %v4497_v20 = vpack.c.bf16 %v2892_v43, %v2891_v63  ;;  %v2861_v31 = vld [vmem:[%s6395_s14 + $0x690] sm:$0xff]  ;;  %v4467_v15 = vpack.c.bf16 %v2844_v48, %v2843_v1  ;;  %v2878_v49 = vld [vmem:[%s6395_s14 + $0x718] sm:$0xff]  ;;  %v2851_v42 = vld [vmem:[%s6395_s14 + $0x640] sm:$0xff] }
 0xe0f   : > { %4450 = vmatprep.subr.bf16.mxu1 %v4449_v54  ;;  %v2893_v54 = vld [vmem:[%s6395_s14 + $0x790] sm:$0xff]  ;;  %v2648_v0 = vmax.f32 %v2562_v2, 0.0  ;;  %v4503_v7 = vpack.c.bf16 %v2878_v49, %v2877_v57  ;;  %v2850_v18 = vld [vmem:[%s6395_s14 + $0x638] sm:$0xff]  ;;  %v2852_v63 = vld [vmem:[%s6395_s14 + $0x648] sm:$0xff] }
 0xe10   : > { %v4501_v59 = vpack.c.bf16 %v2894_v11, %v2893_v54  ;;  %v4479_v40 = vpack.c.bf16 %v2850_v18, %v2849_v13  ;;  %v2883_v43 = vld [vmem:[%s6395_s14 + $0x740] sm:$0xff]  ;;  %v2901_v1 = vld [vmem:[%s6395_s14 + $0x7d0] sm:$0xff]  ;;  %v2902_v48 = vld [vmem:[%s6395_s14 + $0x7d8] sm:$0xff] }
 0xe11   : > { %4420 = vmatpush3.bf16.msra.mxu0 %v4419_v60  ;;  %v4469_v60 = vpack.c.bf16 %v2862_v52, %v2861_v31  ;;  %v2853_v2 = vld [vmem:[%s6395_s14 + $0x650] sm:$0xff]  ;;  %v2854_v31 = vld [vmem:[%s6395_s14 + $0x658] sm:$0xff]  ;;  %v2871_v54 = vld [vmem:[%s6395_s14 + $0x6e0] sm:$0xff] }
 0xe12   : > { %4452 = vmatpush3.bf16.msra.mxu1 %v4451_v61  ;;  %4422 = vmatprep.subr.bf16.mxu0 %v4421_v62  ;;  %v2863_v61 = vld [vmem:[%s6395_s14 + $0x6a0] sm:$0xff]  ;;  %v2864_v62 = vld [vmem:[%s6395_s14 + $0x6a8] sm:$0xff]  ;;  %v2885_v52 = vld [vmem:[%s6395_s14 + $0x750] sm:$0xff]  ;;  %v4487_v56 = vpack.c.bf16 %v2854_v31, %v2853_v2 }
 0xe13   : > { %4454 = vmatprep.subr.bf16.mxu1 %v4453_v5  ;;  %v2650_v5 = vmax.f32 %v2633_v53, 0.0  ;;  %v4473_v8 = vpack.c.bf16 %v2864_v62, %v2863_v61  ;;  %v4517_v53 = vpack.c.bf16 %v2902_v48, %v2901_v1  ;;  %v2872_v11 = vld [vmem:[%s6395_s14 + $0x6e8] sm:$0xff]  ;;  %v2887_v49 = vld [vmem:[%s6395_s14 + $0x760] sm:$0xff] }
 0xe14   : > { %v4489_v57 = vpack.c.bf16 %v2872_v11, %v2871_v54  ;;  %v2888_v62 = vld [vmem:[%s6395_s14 + $0x768] sm:$0xff] }
 0xe15   : > { %4424 = vmatpush3.bf16.msra.mxu0 %v4423_v22  ;;  %v2879_v22 = vld [vmem:[%s6395_s14 + $0x720] sm:$0xff] }
 0xe16   : > { %4456 = vmatpush3.bf16.msra.mxu1 %v4455_v27  ;;  %4426 = vmatprep.subr.bf16.mxu0 %v4425_v23  ;;  %v4505_v27 = vpack.c.bf16 %v2896_v4, %v2895_v50  ;;  %v2880_v23 = vld [vmem:[%s6395_s14 + $0x728] sm:$0xff]  ;;  %v2905_v50 = vld [vmem:[%s6395_s14 + $0x7f0] sm:$0xff]  ;;  %v2906_v4 = vld [vmem:[%s6395_s14 + $0x7f8] sm:$0xff] }
 0xe17   : > { %4458 = vmatprep.subr.bf16.mxu1 %v4457_v26  ;;  %v2898_v26 = vld [vmem:[%s6395_s14 + $0x7b8] sm:$0xff]  ;;  %v4507_v29 = vpack.c.bf16 %v2880_v23, %v2879_v22  ;;  %v4525_v10 = vpack.c.bf16 %v2906_v4, %v2905_v50  ;;  %v2889_v22 = vld [vmem:[%s6395_s14 + $0x770] sm:$0xff] }
 0xe19   : > { %4428 = vmatpush3.bf16.msra.mxu0 %v4427_v32  ;;  %v2881_v32 = vld [vmem:[%s6395_s14 + $0x730] sm:$0xff] }
 0xe1a   : > { %4460 = vmatpush3.bf16.msra.mxu1 %v4459_v16  ;;  %4430 = vmatprep.subr.bf16.mxu0 %v4429_v34  ;;  %v4509_v16 = vpack.c.bf16 %v2898_v26, %v2897_v19  ;;  %v2882_v34 = vld [vmem:[%s6395_s14 + $0x738] sm:$0xff]  ;;  %v2649_v19 = vmax.f32 %v6027_v21, 0.0 }
 0xe1b   : > { %4462 = vmatprep.subr.bf16.mxu1 %v4461_v39  ;;  %v2900_v39 = vld [vmem:[%s6395_s14 + $0x7c8] sm:$0xff]  ;;  %v4511_v17 = vpack.c.bf16 %v2882_v34, %v2881_v32 }
 0xe1c   : > { %v4513_v44 = vpack.c.bf16 %v2900_v39, %v2899_v38 }
 0xe1d   : > { %4432 = vmatpush3.bf16.msra.mxu0 %v4431_v45  ;;  %v2884_v45 = vld [vmem:[%s6395_s14 + $0x748] sm:$0xff] }
 0xe1e   : > { %4464 = vmatpush3.bf16.msra.mxu1 %v4463_v46  ;;  %4466 = vmatprep.subr.bf16.mxu0 %v4465_v47  ;;  %v2869_v46 = vld [vmem:[%s6395_s14 + $0x6d0] sm:$0xff]  ;;  %v2870_v47 = vld [vmem:[%s6395_s14 + $0x6d8] sm:$0xff]  ;;  %v4515_v12 = vpack.c.bf16 %v2884_v45, %v2883_v43 }
 0xe1f   : > { %4498 = vmatprep.subr.bf16.mxu1 %v4497_v20  ;;  %v4483_v20 = vpack.c.bf16 %v2852_v63, %v2851_v42  ;;  %v4485_v14 = vpack.c.bf16 %v2870_v47, %v2869_v46 }
 0xe20   : > { %3259 = vmatmul.mubr.f32.vlgmr.msra.gmra.mrb[24].mxu0 %v2643_v55  ;;  %v2903_v55 = vld [vmem:[%s6395_s14 + $0x7e0] sm:$0xff] }
 0xe21   : > { %3329 = vmatmul.mubr.f32.vlgmr.msra.gmra.mrb[30].mxu1 %v2645_v58  ;;  %4468 = vmatpush3.bf16.msra.mxu0 %v4467_v15  ;;  %v2886_v15 = vld [vmem:[%s6395_s14 + $0x758] sm:$0xff]  ;;  %v2855_v58 = vld [vmem:[%s6395_s14 + $0x660] sm:$0xff] }
 0xe22   : > { %3398 = vmatprep.mubr.f32.mxu0 %v2648_v0  ;;  %4500 = vmatpush3.bf16.msra.mxu1 %v4499_v3  ;;  %v2904_v3 = vld [vmem:[%s6395_s14 + $0x7e8] sm:$0xff]  ;;  %v4519_v51 = vpack.c.bf16 %v2886_v15, %v2885_v52  ;;  %v2873_v0 = vld [vmem:[%s6395_s14 + $0x6f0] sm:$0xff] }
 0xe23   : > { %3468 = vmatprep.mubr.f32.mxu1 %v2650_v5  ;;  %4470 = vmatprep.subr.bf16.mxu0 %v4469_v60  ;;  %v2856_v60 = vld [vmem:[%s6395_s14 + $0x668] sm:$0xff]  ;;  %v4521_v61 = vpack.c.bf16 %v2904_v3, %v2903_v55 }
 0xe24   : > { %4502 = vmatprep.subr.bf16.mxu1 %v4501_v59  ;;  %v2874_v59 = vld [vmem:[%s6395_s14 + $0x6f8] sm:$0xff]  ;;  %v4491_v5 = vpack.c.bf16 %v2856_v60, %v2855_v58 }
 0xe25   : > { %4472 = vmatpush3.bf16.msra.mxu0 %v4471_v6  ;;  %v4523_v6 = vpack.c.bf16 %v2888_v62, %v2887_v49 }
 0xe26   : > { %4504 = vmatpush3.bf16.msra.mxu1 %v4503_v7  ;;  %4474 = vmatprep.subr.bf16.mxu0 %v4473_v8  ;;  %v4493_v7 = vpack.c.bf16 %v2874_v59, %v2873_v0  ;;  %v2857_v8 = vld [vmem:[%s6395_s14 + $0x670] sm:$0xff] }
 0xe27   : > { %4506 = vmatprep.subr.bf16.mxu1 %v4505_v27  ;;  %v2890_v27 = vld [vmem:[%s6395_s14 + $0x778] sm:$0xff]  ;;  %v4495_v23 = vpack.c.bf16 %v2858_v9, %v2857_v8 }
 0xe28   : > { %v4527_v24 = vpack.c.bf16 %v2890_v27, %v2889_v22 }
 0xe29   : > { %4476 = vmatpush3.bf16.msra.mxu0 %v4475_v28 }
 0xe2a   : > { %4508 = vmatpush3.bf16.msra.mxu1 %v4507_v29  ;;  %4478 = vmatprep.subr.bf16.mxu0 %v4477_v30  ;;  %v3630_v29 = vld [vmem:[%s6396_s15] ss:$0 sm:$0xff] }
 0xe2b   : > { %4510 = vmatprep.subr.bf16.mxu1 %v4509_v16 }
 0xe2d   : > { %4480 = vmatpush3.bf16.msra.mxu0 %v4479_v40 }
 0xe2e   : > { %4512 = vmatpush3.bf16.msra.mxu1 %v4511_v17  ;;  %4482 = vmatprep.subr.bf16.mxu0 %v4481_v41 }
 0xe2f   : > { %4514 = vmatprep.subr.bf16.mxu1 %v4513_v44 }
 0xe31   : > { %4484 = vmatpush3.bf16.msra.mxu0 %v4483_v20 }
 0xe32   : > { %4516 = vmatpush3.bf16.msra.mxu1 %v4515_v12  ;;  %4486 = vmatprep.subr.bf16.mxu0 %v4485_v14 }
 0xe33   : > { %4518 = vmatprep.subr.bf16.mxu1 %v4517_v53 }
 0xe35   : > { %4488 = vmatpush3.bf16.msra.mxu0 %v4487_v56 }
 0xe36   : > { %4520 = vmatpush3.bf16.msra.mxu1 %v4519_v51  ;;  %4490 = vmatprep.subr.bf16.mxu0 %v4489_v57 }
 0xe37   : > { %4522 = vmatprep.subr.bf16.mxu1 %v4521_v61  ;;  %v3632_v61 = vld [vmem:[%s6398_s17] ss:$0 sm:$0xff] }
 0xe39   : > { %4492 = vmatpush3.bf16.msra.mxu0 %v4491_v5 }
 0xe3a   : > { %4524 = vmatpush3.bf16.msra.mxu1 %v4523_v6  ;;  %4494 = vmatprep.subr.bf16.mxu0 %v4493_v7 }
 0xe3b   : > { %4526 = vmatprep.subr.bf16.mxu1 %v4525_v10 }
 0xe3d   : > { %4496 = vmatpush3.bf16.msra.mxu0 %v4495_v23 }
 0xe3e   : > { %4528 = vmatpush3.bf16.msra.mxu1 %v4527_v24 }
 0xe40   : > { %3399 = vmatmul.mubr.f32.vlgmr.msra.gmra.mrb[26].mxu0 %v2647_v25 }
 0xe41   : > { %3469 = vmatmul.mubr.f32.vlgmr.msra.gmra.mrb[32].mxu1 %v2649_v19 }
 0xeb3   : > { %v3724_v26 = vpop.f32.mrb[20].mxu0  ;;  %v3759_v28 = vpop.f32.mrb[26].mxu1 }
 0xeb4   : > { %v3725_v30 = vpop.f32.mrb[21].mxu0  ;;  %v3760_v13 = vpop.f32.mrb[27].mxu1 }
 0xeb5   : > { %v3726_v18 = vadd.f32 %v3725_v30, %v3724_v26  ;;  %v3761_v32 = vadd.f32 %v3760_v13, %v3759_v28 }
 0xeb7   : > { %v2981_v16 = vadd.f32 %v3726_v18, %v3630_v29 }
 0xeb9   : > { %v3051_v34 = vadd.f32 %v3761_v32, %v2981_v16 }
 0xed3   : > { %v3794_v35 = vpop.f32.mrb[22].mxu0  ;;  %v3829_v37 = vpop.f32.mrb[28].mxu1 }
 0xed4   : > { %v3795_v36 = vpop.f32.mrb[23].mxu0  ;;  %v3830_v38 = vpop.f32.mrb[29].mxu1 }
 0xed5   : > { %v3796_v39 = vadd.f32 %v3795_v36, %v3794_v35  ;;  %v3831_v21 = vadd.f32 %v3830_v38, %v3829_v37 }
 0xed7   : > { %v3121_v40 = vadd.f32 %v3796_v39, %v3051_v34 }
 0xed9   : > { %v3191_v17 = vadd.f32 %v3831_v21, %v3121_v40 }
 0xef3   : > { %v3864_v41 = vpop.f32.mrb[24].mxu0 }
 0xef4   : > { %v3899_v42 = vpop.f32.mrb[30].mxu1  ;;  %v3865_v63 = vpop.f32.mrb[25].mxu0 }
 0xef5   : > { %v3866_v43 = vadd.f32 %v3865_v63, %v3864_v41  ;;  %v3900_v44 = vpop.f32.mrb[31].mxu1 }
 0xef6   : > { %v3901_v45 = vadd.f32 %v3900_v44, %v3899_v42 }
 0xef7   : > { %v3261_v46 = vadd.f32 %v3866_v43, %v3191_v17 }
 0xef9   : > { %v3331_v47 = vadd.f32 %v3901_v45, %v3261_v46 }
 0xf13   : > { %v3934_v1 = vpop.f32.mrb[26].mxu0 }
 0xf14   : > { %v3969_v48 = vpop.f32.mrb[32].mxu1  ;;  %v3935_v20 = vpop.f32.mrb[27].mxu0 }
 0xf15   : > { %v3936_v12 = vadd.f32 %v3935_v20, %v3934_v1  ;;  %v3970_v14 = vpop.f32.mrb[33].mxu1 }
 0xf16   : > { %v3971_v2 = vadd.f32 %v3970_v14, %v3969_v48 }
 0xf17   : > { %v3401_v31 = vadd.f32 %v3936_v12, %v3331_v47 }
 0xf19   : > { %v3471_v52 = vadd.f32 %v3971_v2, %v3401_v31 }
 0xf1b   : > { %v3474_v53 = vadd.f32 %v3471_v52, %v5188_v33  ;;  %v3631_v33 = vld [vmem:[%s6397_s16] ss:$0 sm:$0xff] }
 0xf1d   : > { %v3477_v15 = vsel %vm605_vm1, %v3474_v53, 0.0 }
 0xf1e   : > { %3478 = vadd.xlane.f32.xlu1 %v3477_v15 }
 0xfab   : > { %v3479_v54 = vpop.xlane.xlu1 %3478 }
 0xfac   : > { %v3480_v11 = vmul.f32 0.015625, %v3479_v54 }
 0xfae   : > { %v3481_v55 = vsub.f32 %v3474_v53, %v3480_v11 }
 0xfb0   : > { %v3482_v3 = vmul.f32 %v3481_v55, %v3481_v55 }
 0xfb2   : > { %v3483_v56 = vsel %vm605_vm1, %v3482_v3, 0.0 }
 0xfb3   : > { %3484 = vadd.xlane.f32.xlu1 %v3483_v56 }
0x1040   : > { %v3485_v51 = vpop.xlane.xlu1 %3484 }
0x1041   : > { %v3486_v57 = vmul.f32 0.015625, %v3485_v51 }
0x1043   : > { %v3487_v58 = vadd.f32 1e-05, %v3486_v57 }
0x1045   : > { %4592 = vrsqrt.f32 %v3487_v58 }
0x104f   : > { %v4593_v60 = vpop.eup %4592 }
0x1050   : > { %v3489_v49 = vmul.f32 %v4593_v60, %v3481_v55 }
0x1052   : > { %v3496_v62 = vmul.f32 %v3631_v33, %v3489_v49 }
0x1054   : > { %v3503_v0 = vadd.f32 %v3632_v61, %v3496_v62 }
0x1056   : > { %3504 = vst.msk [vmem:[%s579_s20] sm:$0xff] %vm605_vm1, %v3503_v0 }
0x1057   : > { %4607 = shalt.err (!%p4604_p3)
}
0x1058   : > { %s4608_s26 = scalar_lea.hbm %s6338_s21, 128  ;;  %s4612_s20 = scalar_lea.hbm %s6399_s18, 256 }
0x1059   : > { %p4609_p4 = scmp.ne.s32.totalorder %s6338_s21, %s4608_s26  ;;  %p4613_p9 = scmp.lt.u32.totalorder %s6338_s21, %s6399_s18 }
0x105a   : > { %p4614_p10 = scmp.lt.u32.totalorder %s4612_s20, %s4608_s26  ;;  %p4616_p12 = scmp.lt.u32.totalorder %s4608_s26, %s6338_s21 }
0x105b   : > { %p4610_p7 = pnand %p4609_p4, %p4798_p5 }
0x105c   : > { %p4615_p11 = por %p4614_p10, %p4613_p9 }
0x105d   : > { %p4611_p8 = pneg %p4610_p7 }
0x105e   : > { %p4617_p13 = por %p4616_p12, %p4615_p11 }
0x1060   : > { %p4618_p0 = pnand %p4617_p13, %p4611_p8 }
0x1062   : > { %4621 = shalt.err (!%p4618_p0)
}
0x1063   : > { %4529 = dma.vmem_to_hbm [thread:$0]  (%p4798_p5), %s6340_s30, 128, %s6338_s21, %s3506_s1  }
0x1064 PF: > { %s6423_s27 = sld [smem:[#allocation7_spill]]  ;;  %s6424_s0 = sld [smem:[#allocation5_spill]] }
0x106a   : > { %p4535_p1 = scmp.ge.s32.totalorder %s6423_s27, 2  ;;  %s3531_s23 = sand.u32 1, %s6424_s0  }
0x106b   : > { %s3532_s24 = scalar_lea.sflag [#allocation3], %s3531_s23 }
0x106c   : > { %p4532_p2 = pnand %p4535_p1, %p4802_p6 }
0x106e   : > { %4639 = dma.done.wait (!%p4532_p2), %s3532_s24, 128  }
0x106f   : > { %4641 = vsyncadd (!%p4532_p2), %s3532_s24, 4294967168  ;;  %s6426_s30 = sld [smem:[#allocation8_spill]]  ;;  %s6427_s26 = sld [smem:[#allocation6_spill]] }
0x1070   : > { %s6428_s29 = sld [smem:[#allocation9_spill]]  ;;  %s6429_s27 = smov %s4648_s28 }
0x1075   : > { %p28_p3 = scmp.ge.s32.totalorder %s6426_s30, 4   ;;  %s6430_s28 = smov %s6427_s26 }
0x1077   :  { %30 = sbr.rel (!%p28_p3) target bundleno = 8 (0x8), region = 130 }
0x107e   :  { %3537 = vsyncpa [#allocation3], 1 }
0x107f   :  { %3539 = vsyncpa [#allocation3 + $0x1], 1 }

</bundles_post_ra>
